<compile_context>
chip_gen: v5e
topology: v5e:2x2
jax: 0.10.0
libtpu: 0.0.40
codegen_flags: <defaults>
</compile_context>

<pallas_src>
import functools

import jax
import jax.numpy as jnp
from jax import lax
from jax.experimental import pallas as pl
from jax.experimental.pallas import tpu as pltpu


def _round_up(x, m):
    return ((x + m - 1) // m) * m


def _lstm_chunk_kernel(lens_ref, gx_ref, whh_ref, out_ref, h_sc, c_sc):
    """Grid = (batch_blocks, time_chunks). One invocation advances the LSTM
    over TB timesteps for one batch block, consuming precomputed input gates."""
    tc = pl.program_id(1)
    TB = gx_ref.shape[0]
    Hp = h_sc.shape[1]

    @pl.when(tc == 0)
    def _():
        h_sc[...] = jnp.zeros_like(h_sc)
        c_sc[...] = jnp.zeros_like(c_sc)

    lens = lens_ref[...]                      # (Nb, 1) int32
    t0 = tc * TB

    def step(ts, carry):
        h, c = carry
        # Only the recurrent projection; input projection + bias precomputed.
        gates = gx_ref[ts] + jnp.dot(h, whh_ref[...],
                                     preferred_element_type=jnp.float32)
        # PyTorch gate order i, f, g, o; slices are 128-lane aligned (Hp%128==0)
        i_g = jax.nn.sigmoid(gates[:, 0 * Hp:1 * Hp])
        f_g = jax.nn.sigmoid(gates[:, 1 * Hp:2 * Hp])
        g_g = jnp.tanh(gates[:, 2 * Hp:3 * Hp])
        o_g = jax.nn.sigmoid(gates[:, 3 * Hp:4 * Hp])
        c_new = f_g * c + i_g * g_g
        h_new = o_g * jnp.tanh(c_new)

        valid = (t0 + ts) < lens              # (Nb, 1) bool, broadcast over Hp
        c = jnp.where(valid, c_new, c)        # state frozen past seq_len
        h = jnp.where(valid, h_new, h)
        # pad_packed_sequence zero-pads hiddens past seq_len
        out_ref[ts] = jnp.where(valid, h_new, jnp.zeros_like(h_new))
        return h, c

    h, c = lax.fori_loop(0, TB, step, (h_sc[...], c_sc[...]), unroll=True)
    h_sc[...] = h
    c_sc[...] = c


@functools.partial(jax.jit, static_argnames=("time_block", "n_batch_blocks"))
def rnn_per_tstep_binary_classifier(inputs_NTF, w_ih, w_hh, b_ih, b_hh,
                                    w_out, b_out, *, time_block=8,
                                    n_batch_blocks=None):
    """Pallas forward. inputs_NTF: (N, T, F) float32 with NaN padding.

    Returns yproba_NT2: (N, T, 2) per-timestep log-probabilities.
    """
    N, T, F = inputs_NTF.shape
    H = w_hh.shape[1]
    Hp = _round_up(H, 128)                    # lane-aligned per-gate width

    # ---- seq lens from all-NaN rows (same rule as the PyTorch module) -------
    keep_NT = jnp.logical_not(jnp.all(jnp.isnan(inputs_NTF), axis=-1))
    seq_lens_N = jnp.sum(keep_NT.astype(jnp.int32), axis=1)          # (N,)
    lens_N1 = seq_lens_N[:, None].astype(jnp.int32)                  # (N, 1)

    # TODO(synk): NaNs inside otherwise-valid timesteps are zeroed here, while
    # PyTorch would propagate them through the LSTM; only all-NaN padding rows
    # follow packed-sequence semantics exactly.
    x_TNF = jnp.nan_to_num(
        jnp.transpose(inputs_NTF, (1, 0, 2)).astype(jnp.float32))    # (T, N, F)

    # ---- per-gate zero padding of parameters to width Hp ---------------------
    def pad_gate_dim(w):                      # (4H, ...) -> (4Hp, ...)
        tail = w.shape[1:]
        w4 = w.reshape((4, H) + tail)
        cfg = [(0, 0), (0, Hp - H)] + [(0, 0)] * len(tail)
        return jnp.pad(w4, cfg).reshape((4 * Hp,) + tail)

    wih_p = pad_gate_dim(w_ih.astype(jnp.float32))                   # (4Hp, F)
    whh_p = pad_gate_dim(w_hh.astype(jnp.float32))                   # (4Hp, H)
    whh_p = jnp.pad(whh_p, ((0, 0), (0, Hp - H)))                    # (4Hp, Hp)
    b_p = pad_gate_dim((b_ih + b_hh).astype(jnp.float32))            # (4Hp,)
    whh_T = jnp.transpose(whh_p)                                     # (Hp, 4Hp)

    # ---- hoisted input projection: one fully parallel GEMM -------------------
    # TODO(synk): gates_x could be streamed as bf16 to halve DMA bytes; kept
    # f32 to match the PyTorch float32 numerics.
    gates_x = jnp.einsum("tnf,gf->tng", x_TNF, wih_p,
                         preferred_element_type=jnp.float32) + b_p   # (T,N,4Hp)

    # ---- time chunking --------------------------------------------------------
    TB = int(time_block)
    T_pad = _round_up(T, TB)
    if T_pad != T:
        gates_x = jnp.pad(gates_x, ((0, T_pad - T), (0, 0), (0, 0)))

    # ---- batch blocking (lets v7x run each half on its own TensorCore) -------
    if n_batch_blocks is None:
        NB = 2 if (N % 2 == 0 and (N // 2) % 8 == 0 and N >= 256) else 1
    else:
        NB = int(n_batch_blocks)
    assert N % NB == 0, "batch must divide evenly into batch blocks"
    Nb = N // NB

    # ---- scoped VMEM budget (raise v5e's 16 MiB default, stay < v7x 64 MiB) --
    gx_blk = TB * Nb * 4 * Hp * 4
    out_blk = TB * Nb * Hp * 4
    vmem_need = (2 * gx_blk + 2 * out_blk + Hp * 4 * Hp * 4
                 + 2 * Nb * Hp * 4 + Nb * 4)
    vmem_limit = int(min(max(2 * vmem_need, 32 * 2 ** 20), 48 * 2 ** 20))

    hiddens = pl.pallas_call(
        _lstm_chunk_kernel,
        out_shape=jax.ShapeDtypeStruct((T_pad, N, Hp), jnp.float32),
        grid_spec=pltpu.PrefetchScalarGridSpec(
            num_scalar_prefetch=0,
            grid=(NB, T_pad // TB),
            in_specs=[
                pl.BlockSpec((Nb, 1), lambda nb, tc: (nb, 0)),             # lens
                pl.BlockSpec((TB, Nb, 4 * Hp), lambda nb, tc: (tc, nb, 0)),  # gates_x
                pl.BlockSpec((Hp, 4 * Hp), lambda nb, tc: (0, 0)),         # W_hh^T
            ],
            out_specs=pl.BlockSpec((TB, Nb, Hp), lambda nb, tc: (tc, nb, 0)),
            scratch_shapes=[
                pltpu.VMEM((Nb, Hp), jnp.float32),   # h state
                pltpu.VMEM((Nb, Hp), jnp.float32),   # c state
            ],
        ),
        compiler_params=pltpu.CompilerParams(
            dimension_semantics=("parallel", "arbitrary"),
            vmem_limit_bytes=vmem_limit),
    )(lens_N1, gates_x, whh_T)

    # ---- hoisted output head: Linear(H, 2) + log_softmax ---------------------
    hid_NTH = jnp.transpose(hiddens[:T, :, :H], (1, 0, 2))           # (N, T, H)
    logits_NT2 = (hid_NTH @ jnp.transpose(w_out.astype(jnp.float32))
                  + b_out.astype(jnp.float32))
    # TODO(synk): PyTorch returns (N, T_max, 2) with dynamic T_max=max(seq_lens);
    # JAX needs static shapes so we return (N, T, 2) (padded rows equal
    # log_softmax(b_out), identical to the zero-padded hiddens case).
    return jax.nn.log_softmax(logits_NT2, axis=-1)


# ----------------------------- reference & init ------------------------------

def _reference_forward(inputs_NTF, w_ih, w_hh, b_ih, b_hh, w_out, b_out):
    """Pure-JAX reference mirroring the PyTorch module (for correctness check)."""
    N, T, F = inputs_NTF.shape
    H = w_hh.shape[1]
    keep = jnp.logical_not(jnp.all(jnp.isnan(inputs_NTF), axis=-1))
    lens = jnp.sum(keep.astype(jnp.int32), axis=1)
    x_TNF = jnp.nan_to_num(
        jnp.transpose(inputs_NTF, (1, 0, 2)).astype(jnp.float32))

    def cell(carry, xt_t):
        h, c = carry
        x_t, t = xt_t
        gates = x_t @ w_ih.T + h @ w_hh.T + b_ih + b_hh
        i_g = jax.nn.sigmoid(gates[:, 0 * H:1 * H])
        f_g = jax.nn.sigmoid(gates[:, 1 * H:2 * H])
        g_g = jnp.tanh(gates[:, 2 * H:3 * H])
        o_g = jax.nn.sigmoid(gates[:, 3 * H:4 * H])
        c_new = f_g * c + i_g * g_g
        h_new = o_g * jnp.tanh(c_new)
        valid = (t < lens)[:, None]
        c = jnp.where(valid, c_new, c)
        h = jnp.where(valid, h_new, h)
        return (h, c), jnp.where(valid, h_new, 0.0)

    init = (jnp.zeros((N, H), jnp.float32), jnp.zeros((N, H), jnp.float32))
    _, h_TNH = lax.scan(cell, init, (x_TNF, jnp.arange(T)))
    hid_NTH = jnp.transpose(h_TNH, (1, 0, 2))
    logits = hid_NTH @ w_out.T + b_out
    return jax.nn.log_softmax(logits, axis=-1)


def _xavier_uniform(key, shape, gain=1.0):
    fan_out, fan_in = shape
    limit = gain * jnp.sqrt(6.0 / (fan_in + fan_out))
    return jax.random.uniform(key, shape, jnp.float32, -limit, limit)


def init_params(key, n_inputs, n_hiddens, initialization_gain=1.0):
    kih, khh, kbi, kbh, kow, kob = jax.random.split(key, 6)
    H, F = n_hiddens, n_inputs
    bound = 1.0 / jnp.sqrt(jnp.float32(H))
    w_ih = _xavier_uniform(kih, (4 * H, F), initialization_gain)
    w_hh = _xavier_uniform(khh, (4 * H, H), initialization_gain)
    b_ih = jax.random.uniform(kbi, (4 * H,), jnp.float32, -bound, bound)
    b_hh = jax.random.uniform(kbh, (4 * H,), jnp.float32, -bound, bound)
    w_out = _xavier_uniform(kow, (2, H), initialization_gain)
    b_out = jax.random.uniform(kob, (2,), jnp.float32, -bound, bound)
    return w_ih, w_hh, b_ih, b_hh, w_out, b_out


if __name__ == "__main__":
    key = jax.random.PRNGKey(0)
    k_param, k_data = jax.random.split(key)

    N, T, F, H = 8, 12, 4, 32
    params = init_params(k_param, n_inputs=F, n_hiddens=H,
                         initialization_gain=1.0)

    # Deterministic inputs with trailing NaN padding (variable-length sequences)
    x = jax.random.normal(k_data, (N, T, F), jnp.float32)
    seq_lens = jnp.array([12, 7, 3, 12, 5, 1, 9, 12], dtype=jnp.int32)
    pad_mask = (jnp.arange(T)[None, :] >= seq_lens[:, None])[:, :, None]
    inputs_NTF = jnp.where(pad_mask, jnp.nan, x)

    yproba_NT2 = rnn_per_tstep_binary_classifier(inputs_NTF, *params)
    yproba_NT2 = jax.block_until_ready(yproba_NT2)

    assert yproba_NT2.shape == (N, T, 2)
    assert not bool(jnp.any(jnp.isnan(yproba_NT2)))
    # log-probabilities must sum (in prob space) to 1 per timestep
    assert bool(jnp.allclose(jnp.sum(jnp.exp(yproba_NT2), axis=-1), 1.0,
                             atol=1e-5))
    # match pure-JAX reference of the PyTorch module
    ref = _reference_forward(inputs_NTF, *params)
    max_err = float(jnp.max(jnp.abs(yproba_NT2 - ref)))
    assert bool(jnp.allclose(yproba_NT2, ref, atol=1e-4, rtol=1e-4)), max_err
    print("KERNEL_OK")
</pallas_src>

<mosaic_0001>
module attributes {stable_mosaic.version = 11 : i64} {
  func.func @_lstm_chunk_kernel(%arg0: i32, %arg1: i32, %arg2: memref<8x1xi32, #tpu.memory_space<vmem>>, %arg3: memref<8x8x512xf32, #tpu.memory_space<vmem>>, %arg4: memref<128x512xf32, #tpu.memory_space<vmem>>, %arg5: memref<8x8x128xf32, #tpu.memory_space<vmem>>, %arg6: memref<8x128xf32, #tpu.memory_space<vmem>>, %arg7: memref<8x128xf32, #tpu.memory_space<vmem>>) attributes {dimension_semantics = [#tpu.dimension_semantics<parallel>, #tpu.dimension_semantics<arbitrary>], iteration_bounds = array<i64: 1, 2>, scalar_prefetch = 0 : i64, scratch_operands = 2 : i64, tpu.core_type = #tpu.core_type<tc>, window_params = [{transform_indices = @transform_0, window_bounds = array<i64: 8, 1>}, {transform_indices = @transform_1, window_bounds = array<i64: 8, 8, 512>}, {pipeline_mode = #tpu.pipeline_mode<synchronous>, transform_indices = @transform_2, window_bounds = array<i64: 128, 512>}, {transform_indices = @transform_3, window_bounds = array<i64: 8, 8, 128>}]} {
    %c0_i32 = arith.constant 0 : i32
    %0 = arith.cmpi eq, %arg1, %c0_i32 : i32
    %1 = arith.extui %0 : i1 to i32
    %c0_i32_0 = arith.constant 0 : i32
    %2 = arith.cmpi ne, %1, %c0_i32_0 : i32
    scf.if %2 {
      %cst_99 = arith.constant 0.000000e+00 : f32
      %393 = vector.broadcast %cst_99 : f32 to vector<8x128xf32>
      %c0_100 = arith.constant 0 : index
      %c0_101 = arith.constant 0 : index
      %394 = vector.load %arg6[%c0_100, %c0_101] : memref<8x128xf32, #tpu.memory_space<vmem>>, vector<8x128xf32>
      tpu.vector_store %arg6[%c0_100, %c0_101], %393 {strides = array<i32>} : memref<8x128xf32, #tpu.memory_space<vmem>>, vector<8x128xf32>,
      %cst_102 = arith.constant 0.000000e+00 : f32
      %395 = vector.broadcast %cst_102 : f32 to vector<8x128xf32>
      %c0_103 = arith.constant 0 : index
      %c0_104 = arith.constant 0 : index
      %396 = vector.load %arg7[%c0_103, %c0_104] : memref<8x128xf32, #tpu.memory_space<vmem>>, vector<8x128xf32>
      tpu.vector_store %arg7[%c0_103, %c0_104], %395 {strides = array<i32>} : memref<8x128xf32, #tpu.memory_space<vmem>>, vector<8x128xf32>,
    } else {
    }
    %c0 = arith.constant 0 : index
    %c0_1 = arith.constant 0 : index
    %3 = vector.load %arg2[%c0, %c0_1] : memref<8x1xi32, #tpu.memory_space<vmem>>, vector<8x1xi32>
    %c8_i32 = arith.constant 8 : i32
    %4 = arith.muli %arg1, %c8_i32 : i32
    %c0_2 = arith.constant 0 : index
    %c0_3 = arith.constant 0 : index
    %5 = vector.load %arg6[%c0_2, %c0_3] : memref<8x128xf32, #tpu.memory_space<vmem>>, vector<8x128xf32>
    %c0_4 = arith.constant 0 : index
    %c0_5 = arith.constant 0 : index
    %6 = vector.load %arg7[%c0_4, %c0_5] : memref<8x128xf32, #tpu.memory_space<vmem>>, vector<8x128xf32>
    %c0_i32_6 = arith.constant 0 : i32
    %7 = arith.index_cast %c0_i32_6 : i32 to index
    %c0_7 = arith.constant 0 : index
    %c0_8 = arith.constant 0 : index
    %8 = vector.load %arg3[%7, %c0_7, %c0_8] : memref<8x8x512xf32, #tpu.memory_space<vmem>>, vector<1x8x512xf32>
    %9 = vector.shape_cast %8 : vector<1x8x512xf32> to vector<8x512xf32>
    %c0_9 = arith.constant 0 : index
    %c0_10 = arith.constant 0 : index
    %10 = vector.load %arg4[%c0_9, %c0_10] : memref<128x512xf32, #tpu.memory_space<vmem>>, vector<128x512xf32>
    %cst = arith.constant dense<0.000000e+00> : vector<8x512xf32>
    %11 = tpu.matmul %5, %10, %cst {dimension_numbers = #tpu.dot_dimension_numbers<[1], [0], [0], [1], [0, 0, 1, 1], [], []>} : vector<8x128xf32>, vector<128x512xf32>, vector<8x512xf32> -> vector<8x512xf32>
    %12 = arith.addf %9, %11 : vector<8x512xf32>
    %13 = vector.extract_strided_slice %12 {offsets = [0, 0], sizes = [8, 128], strides = [1, 1]} : vector<8x512xf32> to vector<8x128xf32>
    %14 = arith.negf %13 : vector<8x128xf32>
    %15 = math.exp %14 : vector<8x128xf32>
    %cst_11 = arith.constant 1.000000e+00 : f32
    %16 = vector.broadcast %cst_11 : f32 to vector<8x128xf32>
    %17 = arith.addf %16, %15 : vector<8x128xf32>
    %18 = arith.divf %16, %17 : vector<8x128xf32>
    %19 = vector.extract_strided_slice %12 {offsets = [0, 128], sizes = [8, 128], strides = [1, 1]} : vector<8x512xf32> to vector<8x128xf32>
    %20 = arith.negf %19 : vector<8x128xf32>
    %21 = math.exp %20 : vector<8x128xf32>
    %cst_12 = arith.constant 1.000000e+00 : f32
    %22 = vector.broadcast %cst_12 : f32 to vector<8x128xf32>
    %23 = arith.addf %22, %21 : vector<8x128xf32>
    %24 = arith.divf %22, %23 : vector<8x128xf32>
    %25 = vector.extract_strided_slice %12 {offsets = [0, 256], sizes = [8, 128], strides = [1, 1]} : vector<8x512xf32> to vector<8x128xf32>
    %26 = math.tanh %25 : vector<8x128xf32>
    %27 = vector.extract_strided_slice %12 {offsets = [0, 384], sizes = [8, 128], strides = [1, 1]} : vector<8x512xf32> to vector<8x128xf32>
    %28 = arith.negf %27 : vector<8x128xf32>
    %29 = math.exp %28 : vector<8x128xf32>
    %cst_13 = arith.constant 1.000000e+00 : f32
    %30 = vector.broadcast %cst_13 : f32 to vector<8x128xf32>
    %31 = arith.addf %30, %29 : vector<8x128xf32>
    %32 = arith.divf %30, %31 : vector<8x128xf32>
    %33 = arith.mulf %24, %6 : vector<8x128xf32>
    %34 = arith.mulf %18, %26 : vector<8x128xf32>
    %35 = arith.addf %33, %34 : vector<8x128xf32>
    %36 = math.tanh %35 : vector<8x128xf32>
    %37 = arith.mulf %32, %36 : vector<8x128xf32>
    %38 = arith.addi %4, %c0_i32_6 : i32
    %39 = vector.broadcast %38 : i32 to vector<8x1xi32>
    %40 = arith.cmpi slt, %39, %3 : vector<8x1xi32>
    %41 = vector.shape_cast %40 : vector<8x1xi1> to vector<8x1xi1>
    %42 = vector.broadcast %41 : vector<8x1xi1> to vector<8x128xi1>
    %43 = arith.select %42, %35, %6 : vector<8x128xi1>, vector<8x128xf32>
    %44 = vector.shape_cast %40 : vector<8x1xi1> to vector<8x1xi1>
    %45 = vector.broadcast %44 : vector<8x1xi1> to vector<8x128xi1>
    %46 = arith.select %45, %37, %5 : vector<8x128xi1>, vector<8x128xf32>
    %cst_14 = arith.constant 0.000000e+00 : f32
    %47 = vector.broadcast %cst_14 : f32 to vector<8x128xf32>
    %48 = vector.shape_cast %40 : vector<8x1xi1> to vector<8x1xi1>
    %49 = vector.broadcast %48 : vector<8x1xi1> to vector<8x128xi1>
    %50 = arith.select %49, %37, %47 : vector<8x128xi1>, vector<8x128xf32>
    %51 = arith.index_cast %c0_i32_6 : i32 to index
    %c0_15 = arith.constant 0 : index
    %c0_16 = arith.constant 0 : index
    %52 = vector.load %arg5[%51, %c0_15, %c0_16] : memref<8x8x128xf32, #tpu.memory_space<vmem>>, vector<1x8x128xf32>
    %53 = vector.shape_cast %52 : vector<1x8x128xf32> to vector<8x128xf32>
    %54 = vector.shape_cast %50 : vector<8x128xf32> to vector<1x8x128xf32>
    tpu.vector_store %arg5[%51, %c0_15, %c0_16], %54 {strides = array<i32>} : memref<8x8x128xf32, #tpu.memory_space<vmem>>, vector<1x8x128xf32>,
    %c1_i32 = arith.constant 1 : i32
    %55 = arith.index_cast %c1_i32 : i32 to index
    %c0_17 = arith.constant 0 : index
    %c0_18 = arith.constant 0 : index
    %56 = vector.load %arg3[%55, %c0_17, %c0_18] : memref<8x8x512xf32, #tpu.memory_space<vmem>>, vector<1x8x512xf32>
    %57 = vector.shape_cast %56 : vector<1x8x512xf32> to vector<8x512xf32>
    %c0_19 = arith.constant 0 : index
    %c0_20 = arith.constant 0 : index
    %58 = vector.load %arg4[%c0_19, %c0_20] : memref<128x512xf32, #tpu.memory_space<vmem>>, vector<128x512xf32>
    %cst_21 = arith.constant dense<0.000000e+00> : vector<8x512xf32>
    %59 = tpu.matmul %46, %58, %cst_21 {dimension_numbers = #tpu.dot_dimension_numbers<[1], [0], [0], [1], [0, 0, 1, 1], [], []>} : vector<8x128xf32>, vector<128x512xf32>, vector<8x512xf32> -> vector<8x512xf32>
    %60 = arith.addf %57, %59 : vector<8x512xf32>
    %61 = vector.extract_strided_slice %60 {offsets = [0, 0], sizes = [8, 128], strides = [1, 1]} : vector<8x512xf32> to vector<8x128xf32>
    %62 = arith.negf %61 : vector<8x128xf32>
    %63 = math.exp %62 : vector<8x128xf32>
    %cst_22 = arith.constant 1.000000e+00 : f32
    %64 = vector.broadcast %cst_22 : f32 to vector<8x128xf32>
    %65 = arith.addf %64, %63 : vector<8x128xf32>
    %66 = arith.divf %64, %65 : vector<8x128xf32>
    %67 = vector.extract_strided_slice %60 {offsets = [0, 128], sizes = [8, 128], strides = [1, 1]} : vector<8x512xf32> to vector<8x128xf32>
    %68 = arith.negf %67 : vector<8x128xf32>
    %69 = math.exp %68 : vector<8x128xf32>
    %cst_23 = arith.constant 1.000000e+00 : f32
    %70 = vector.broadcast %cst_23 : f32 to vector<8x128xf32>
    %71 = arith.addf %70, %69 : vector<8x128xf32>
    %72 = arith.divf %70, %71 : vector<8x128xf32>
    %73 = vector.extract_strided_slice %60 {offsets = [0, 256], sizes = [8, 128], strides = [1, 1]} : vector<8x512xf32> to vector<8x128xf32>
    %74 = math.tanh %73 : vector<8x128xf32>
    %75 = vector.extract_strided_slice %60 {offsets = [0, 384], sizes = [8, 128], strides = [1, 1]} : vector<8x512xf32> to vector<8x128xf32>
    %76 = arith.negf %75 : vector<8x128xf32>
    %77 = math.exp %76 : vector<8x128xf32>
    %cst_24 = arith.constant 1.000000e+00 : f32
    %78 = vector.broadcast %cst_24 : f32 to vector<8x128xf32>
    %79 = arith.addf %78, %77 : vector<8x128xf32>
    %80 = arith.divf %78, %79 : vector<8x128xf32>
    %81 = arith.mulf %72, %43 : vector<8x128xf32>
    %82 = arith.mulf %66, %74 : vector<8x128xf32>
    %83 = arith.addf %81, %82 : vector<8x128xf32>
    %84 = math.tanh %83 : vector<8x128xf32>
    %85 = arith.mulf %80, %84 : vector<8x128xf32>
    %86 = arith.addi %4, %c1_i32 : i32
    %87 = vector.broadcast %86 : i32 to vector<8x1xi32>
    %88 = arith.cmpi slt, %87, %3 : vector<8x1xi32>
    %89 = vector.shape_cast %88 : vector<8x1xi1> to vector<8x1xi1>
    %90 = vector.broadcast %89 : vector<8x1xi1> to vector<8x128xi1>
    %91 = arith.select %90, %83, %43 : vector<8x128xi1>, vector<8x128xf32>
    %92 = vector.shape_cast %88 : vector<8x1xi1> to vector<8x1xi1>
    %93 = vector.broadcast %92 : vector<8x1xi1> to vector<8x128xi1>
    %94 = arith.select %93, %85, %46 : vector<8x128xi1>, vector<8x128xf32>
    %cst_25 = arith.constant 0.000000e+00 : f32
    %95 = vector.broadcast %cst_25 : f32 to vector<8x128xf32>
    %96 = vector.shape_cast %88 : vector<8x1xi1> to vector<8x1xi1>
    %97 = vector.broadcast %96 : vector<8x1xi1> to vector<8x128xi1>
    %98 = arith.select %97, %85, %95 : vector<8x128xi1>, vector<8x128xf32>
    %99 = arith.index_cast %c1_i32 : i32 to index
    %c0_26 = arith.constant 0 : index
    %c0_27 = arith.constant 0 : index
    %100 = vector.load %arg5[%99, %c0_26, %c0_27] : memref<8x8x128xf32, #tpu.memory_space<vmem>>, vector<1x8x128xf32>
    %101 = vector.shape_cast %100 : vector<1x8x128xf32> to vector<8x128xf32>
    %102 = vector.shape_cast %98 : vector<8x128xf32> to vector<1x8x128xf32>
    tpu.vector_store %arg5[%99, %c0_26, %c0_27], %102 {strides = array<i32>} : memref<8x8x128xf32, #tpu.memory_space<vmem>>, vector<1x8x128xf32>,
    %c2_i32 = arith.constant 2 : i32
    %103 = arith.index_cast %c2_i32 : i32 to index
    %c0_28 = arith.constant 0 : index
    %c0_29 = arith.constant 0 : index
    %104 = vector.load %arg3[%103, %c0_28, %c0_29] : memref<8x8x512xf32, #tpu.memory_space<vmem>>, vector<1x8x512xf32>
    %105 = vector.shape_cast %104 : vector<1x8x512xf32> to vector<8x512xf32>
    %c0_30 = arith.constant 0 : index
    %c0_31 = arith.constant 0 : index
    %106 = vector.load %arg4[%c0_30, %c0_31] : memref<128x512xf32, #tpu.memory_space<vmem>>, vector<128x512xf32>
    %cst_32 = arith.constant dense<0.000000e+00> : vector<8x512xf32>
    %107 = tpu.matmul %94, %106, %cst_32 {dimension_numbers = #tpu.dot_dimension_numbers<[1], [0], [0], [1], [0, 0, 1, 1], [], []>} : vector<8x128xf32>, vector<128x512xf32>, vector<8x512xf32> -> vector<8x512xf32>
    %108 = arith.addf %105, %107 : vector<8x512xf32>
    %109 = vector.extract_strided_slice %108 {offsets = [0, 0], sizes = [8, 128], strides = [1, 1]} : vector<8x512xf32> to vector<8x128xf32>
    %110 = arith.negf %109 : vector<8x128xf32>
    %111 = math.exp %110 : vector<8x128xf32>
    %cst_33 = arith.constant 1.000000e+00 : f32
    %112 = vector.broadcast %cst_33 : f32 to vector<8x128xf32>
    %113 = arith.addf %112, %111 : vector<8x128xf32>
    %114 = arith.divf %112, %113 : vector<8x128xf32>
    %115 = vector.extract_strided_slice %108 {offsets = [0, 128], sizes = [8, 128], strides = [1, 1]} : vector<8x512xf32> to vector<8x128xf32>
    %116 = arith.negf %115 : vector<8x128xf32>
    %117 = math.exp %116 : vector<8x128xf32>
    %cst_34 = arith.constant 1.000000e+00 : f32
    %118 = vector.broadcast %cst_34 : f32 to vector<8x128xf32>
    %119 = arith.addf %118, %117 : vector<8x128xf32>
    %120 = arith.divf %118, %119 : vector<8x128xf32>
    %121 = vector.extract_strided_slice %108 {offsets = [0, 256], sizes = [8, 128], strides = [1, 1]} : vector<8x512xf32> to vector<8x128xf32>
    %122 = math.tanh %121 : vector<8x128xf32>
    %123 = vector.extract_strided_slice %108 {offsets = [0, 384], sizes = [8, 128], strides = [1, 1]} : vector<8x512xf32> to vector<8x128xf32>
    %124 = arith.negf %123 : vector<8x128xf32>
    %125 = math.exp %124 : vector<8x128xf32>
    %cst_35 = arith.constant 1.000000e+00 : f32
    %126 = vector.broadcast %cst_35 : f32 to vector<8x128xf32>
    %127 = arith.addf %126, %125 : vector<8x128xf32>
    %128 = arith.divf %126, %127 : vector<8x128xf32>
    %129 = arith.mulf %120, %91 : vector<8x128xf32>
    %130 = arith.mulf %114, %122 : vector<8x128xf32>
    %131 = arith.addf %129, %130 : vector<8x128xf32>
    %132 = math.tanh %131 : vector<8x128xf32>
    %133 = arith.mulf %128, %132 : vector<8x128xf32>
    %134 = arith.addi %4, %c2_i32 : i32
    %135 = vector.broadcast %134 : i32 to vector<8x1xi32>
    %136 = arith.cmpi slt, %135, %3 : vector<8x1xi32>
    %137 = vector.shape_cast %136 : vector<8x1xi1> to vector<8x1xi1>
    %138 = vector.broadcast %137 : vector<8x1xi1> to vector<8x128xi1>
    %139 = arith.select %138, %131, %91 : vector<8x128xi1>, vector<8x128xf32>
    %140 = vector.shape_cast %136 : vector<8x1xi1> to vector<8x1xi1>
    %141 = vector.broadcast %140 : vector<8x1xi1> to vector<8x128xi1>
    %142 = arith.select %141, %133, %94 : vector<8x128xi1>, vector<8x128xf32>
    %cst_36 = arith.constant 0.000000e+00 : f32
    %143 = vector.broadcast %cst_36 : f32 to vector<8x128xf32>
    %144 = vector.shape_cast %136 : vector<8x1xi1> to vector<8x1xi1>
    %145 = vector.broadcast %144 : vector<8x1xi1> to vector<8x128xi1>
    %146 = arith.select %145, %133, %143 : vector<8x128xi1>, vector<8x128xf32>
    %147 = arith.index_cast %c2_i32 : i32 to index
    %c0_37 = arith.constant 0 : index
    %c0_38 = arith.constant 0 : index
    %148 = vector.load %arg5[%147, %c0_37, %c0_38] : memref<8x8x128xf32, #tpu.memory_space<vmem>>, vector<1x8x128xf32>
    %149 = vector.shape_cast %148 : vector<1x8x128xf32> to vector<8x128xf32>
    %150 = vector.shape_cast %146 : vector<8x128xf32> to vector<1x8x128xf32>
    tpu.vector_store %arg5[%147, %c0_37, %c0_38], %150 {strides = array<i32>} : memref<8x8x128xf32, #tpu.memory_space<vmem>>, vector<1x8x128xf32>,
    %c3_i32 = arith.constant 3 : i32
    %151 = arith.index_cast %c3_i32 : i32 to index
    %c0_39 = arith.constant 0 : index
    %c0_40 = arith.constant 0 : index
    %152 = vector.load %arg3[%151, %c0_39, %c0_40] : memref<8x8x512xf32, #tpu.memory_space<vmem>>, vector<1x8x512xf32>
    %153 = vector.shape_cast %152 : vector<1x8x512xf32> to vector<8x512xf32>
    %c0_41 = arith.constant 0 : index
    %c0_42 = arith.constant 0 : index
    %154 = vector.load %arg4[%c0_41, %c0_42] : memref<128x512xf32, #tpu.memory_space<vmem>>, vector<128x512xf32>
    %cst_43 = arith.constant dense<0.000000e+00> : vector<8x512xf32>
    %155 = tpu.matmul %142, %154, %cst_43 {dimension_numbers = #tpu.dot_dimension_numbers<[1], [0], [0], [1], [0, 0, 1, 1], [], []>} : vector<8x128xf32>, vector<128x512xf32>, vector<8x512xf32> -> vector<8x512xf32>
    %156 = arith.addf %153, %155 : vector<8x512xf32>
    %157 = vector.extract_strided_slice %156 {offsets = [0, 0], sizes = [8, 128], strides = [1, 1]} : vector<8x512xf32> to vector<8x128xf32>
    %158 = arith.negf %157 : vector<8x128xf32>
    %159 = math.exp %158 : vector<8x128xf32>
    %cst_44 = arith.constant 1.000000e+00 : f32
    %160 = vector.broadcast %cst_44 : f32 to vector<8x128xf32>
    %161 = arith.addf %160, %159 : vector<8x128xf32>
    %162 = arith.divf %160, %161 : vector<8x128xf32>
    %163 = vector.extract_strided_slice %156 {offsets = [0, 128], sizes = [8, 128], strides = [1, 1]} : vector<8x512xf32> to vector<8x128xf32>
    %164 = arith.negf %163 : vector<8x128xf32>
    %165 = math.exp %164 : vector<8x128xf32>
    %cst_45 = arith.constant 1.000000e+00 : f32
    %166 = vector.broadcast %cst_45 : f32 to vector<8x128xf32>
    %167 = arith.addf %166, %165 : vector<8x128xf32>
    %168 = arith.divf %166, %167 : vector<8x128xf32>
    %169 = vector.extract_strided_slice %156 {offsets = [0, 256], sizes = [8, 128], strides = [1, 1]} : vector<8x512xf32> to vector<8x128xf32>
    %170 = math.tanh %169 : vector<8x128xf32>
    %171 = vector.extract_strided_slice %156 {offsets = [0, 384], sizes = [8, 128], strides = [1, 1]} : vector<8x512xf32> to vector<8x128xf32>
    %172 = arith.negf %171 : vector<8x128xf32>
    %173 = math.exp %172 : vector<8x128xf32>
    %cst_46 = arith.constant 1.000000e+00 : f32
    %174 = vector.broadcast %cst_46 : f32 to vector<8x128xf32>
    %175 = arith.addf %174, %173 : vector<8x128xf32>
    %176 = arith.divf %174, %175 : vector<8x128xf32>
    %177 = arith.mulf %168, %139 : vector<8x128xf32>
    %178 = arith.mulf %162, %170 : vector<8x128xf32>
    %179 = arith.addf %177, %178 : vector<8x128xf32>
    %180 = math.tanh %179 : vector<8x128xf32>
    %181 = arith.mulf %176, %180 : vector<8x128xf32>
    %182 = arith.addi %4, %c3_i32 : i32
    %183 = vector.broadcast %182 : i32 to vector<8x1xi32>
    %184 = arith.cmpi slt, %183, %3 : vector<8x1xi32>
    %185 = vector.shape_cast %184 : vector<8x1xi1> to vector<8x1xi1>
    %186 = vector.broadcast %185 : vector<8x1xi1> to vector<8x128xi1>
    %187 = arith.select %186, %179, %139 : vector<8x128xi1>, vector<8x128xf32>
    %188 = vector.shape_cast %184 : vector<8x1xi1> to vector<8x1xi1>
    %189 = vector.broadcast %188 : vector<8x1xi1> to vector<8x128xi1>
    %190 = arith.select %189, %181, %142 : vector<8x128xi1>, vector<8x128xf32>
    %cst_47 = arith.constant 0.000000e+00 : f32
    %191 = vector.broadcast %cst_47 : f32 to vector<8x128xf32>
    %192 = vector.shape_cast %184 : vector<8x1xi1> to vector<8x1xi1>
    %193 = vector.broadcast %192 : vector<8x1xi1> to vector<8x128xi1>
    %194 = arith.select %193, %181, %191 : vector<8x128xi1>, vector<8x128xf32>
    %195 = arith.index_cast %c3_i32 : i32 to index
    %c0_48 = arith.constant 0 : index
    %c0_49 = arith.constant 0 : index
    %196 = vector.load %arg5[%195, %c0_48, %c0_49] : memref<8x8x128xf32, #tpu.memory_space<vmem>>, vector<1x8x128xf32>
    %197 = vector.shape_cast %196 : vector<1x8x128xf32> to vector<8x128xf32>
    %198 = vector.shape_cast %194 : vector<8x128xf32> to vector<1x8x128xf32>
    tpu.vector_store %arg5[%195, %c0_48, %c0_49], %198 {strides = array<i32>} : memref<8x8x128xf32, #tpu.memory_space<vmem>>, vector<1x8x128xf32>,
    %c4_i32 = arith.constant 4 : i32
    %199 = arith.index_cast %c4_i32 : i32 to index
    %c0_50 = arith.constant 0 : index
    %c0_51 = arith.constant 0 : index
    %200 = vector.load %arg3[%199, %c0_50, %c0_51] : memref<8x8x512xf32, #tpu.memory_space<vmem>>, vector<1x8x512xf32>
    %201 = vector.shape_cast %200 : vector<1x8x512xf32> to vector<8x512xf32>
    %c0_52 = arith.constant 0 : index
    %c0_53 = arith.constant 0 : index
    %202 = vector.load %arg4[%c0_52, %c0_53] : memref<128x512xf32, #tpu.memory_space<vmem>>, vector<128x512xf32>
    %cst_54 = arith.constant dense<0.000000e+00> : vector<8x512xf32>
    %203 = tpu.matmul %190, %202, %cst_54 {dimension_numbers = #tpu.dot_dimension_numbers<[1], [0], [0], [1], [0, 0, 1, 1], [], []>} : vector<8x128xf32>, vector<128x512xf32>, vector<8x512xf32> -> vector<8x512xf32>
    %204 = arith.addf %201, %203 : vector<8x512xf32>
    %205 = vector.extract_strided_slice %204 {offsets = [0, 0], sizes = [8, 128], strides = [1, 1]} : vector<8x512xf32> to vector<8x128xf32>
    %206 = arith.negf %205 : vector<8x128xf32>
    %207 = math.exp %206 : vector<8x128xf32>
    %cst_55 = arith.constant 1.000000e+00 : f32
    %208 = vector.broadcast %cst_55 : f32 to vector<8x128xf32>
    %209 = arith.addf %208, %207 : vector<8x128xf32>
    %210 = arith.divf %208, %209 : vector<8x128xf32>
    %211 = vector.extract_strided_slice %204 {offsets = [0, 128], sizes = [8, 128], strides = [1, 1]} : vector<8x512xf32> to vector<8x128xf32>
    %212 = arith.negf %211 : vector<8x128xf32>
    %213 = math.exp %212 : vector<8x128xf32>
    %cst_56 = arith.constant 1.000000e+00 : f32
    %214 = vector.broadcast %cst_56 : f32 to vector<8x128xf32>
    %215 = arith.addf %214, %213 : vector<8x128xf32>
    %216 = arith.divf %214, %215 : vector<8x128xf32>
    %217 = vector.extract_strided_slice %204 {offsets = [0, 256], sizes = [8, 128], strides = [1, 1]} : vector<8x512xf32> to vector<8x128xf32>
    %218 = math.tanh %217 : vector<8x128xf32>
    %219 = vector.extract_strided_slice %204 {offsets = [0, 384], sizes = [8, 128], strides = [1, 1]} : vector<8x512xf32> to vector<8x128xf32>
    %220 = arith.negf %219 : vector<8x128xf32>
    %221 = math.exp %220 : vector<8x128xf32>
    %cst_57 = arith.constant 1.000000e+00 : f32
    %222 = vector.broadcast %cst_57 : f32 to vector<8x128xf32>
    %223 = arith.addf %222, %221 : vector<8x128xf32>
    %224 = arith.divf %222, %223 : vector<8x128xf32>
    %225 = arith.mulf %216, %187 : vector<8x128xf32>
    %226 = arith.mulf %210, %218 : vector<8x128xf32>
    %227 = arith.addf %225, %226 : vector<8x128xf32>
    %228 = math.tanh %227 : vector<8x128xf32>
    %229 = arith.mulf %224, %228 : vector<8x128xf32>
    %230 = arith.addi %4, %c4_i32 : i32
    %231 = vector.broadcast %230 : i32 to vector<8x1xi32>
    %232 = arith.cmpi slt, %231, %3 : vector<8x1xi32>
    %233 = vector.shape_cast %232 : vector<8x1xi1> to vector<8x1xi1>
    %234 = vector.broadcast %233 : vector<8x1xi1> to vector<8x128xi1>
    %235 = arith.select %234, %227, %187 : vector<8x128xi1>, vector<8x128xf32>
    %236 = vector.shape_cast %232 : vector<8x1xi1> to vector<8x1xi1>
    %237 = vector.broadcast %236 : vector<8x1xi1> to vector<8x128xi1>
    %238 = arith.select %237, %229, %190 : vector<8x128xi1>, vector<8x128xf32>
    %cst_58 = arith.constant 0.000000e+00 : f32
    %239 = vector.broadcast %cst_58 : f32 to vector<8x128xf32>
    %240 = vector.shape_cast %232 : vector<8x1xi1> to vector<8x1xi1>
    %241 = vector.broadcast %240 : vector<8x1xi1> to vector<8x128xi1>
    %242 = arith.select %241, %229, %239 : vector<8x128xi1>, vector<8x128xf32>
    %243 = arith.index_cast %c4_i32 : i32 to index
    %c0_59 = arith.constant 0 : index
    %c0_60 = arith.constant 0 : index
    %244 = vector.load %arg5[%243, %c0_59, %c0_60] : memref<8x8x128xf32, #tpu.memory_space<vmem>>, vector<1x8x128xf32>
    %245 = vector.shape_cast %244 : vector<1x8x128xf32> to vector<8x128xf32>
    %246 = vector.shape_cast %242 : vector<8x128xf32> to vector<1x8x128xf32>
    tpu.vector_store %arg5[%243, %c0_59, %c0_60], %246 {strides = array<i32>} : memref<8x8x128xf32, #tpu.memory_space<vmem>>, vector<1x8x128xf32>,
    %c5_i32 = arith.constant 5 : i32
    %247 = arith.index_cast %c5_i32 : i32 to index
    %c0_61 = arith.constant 0 : index
    %c0_62 = arith.constant 0 : index
    %248 = vector.load %arg3[%247, %c0_61, %c0_62] : memref<8x8x512xf32, #tpu.memory_space<vmem>>, vector<1x8x512xf32>
    %249 = vector.shape_cast %248 : vector<1x8x512xf32> to vector<8x512xf32>
    %c0_63 = arith.constant 0 : index
    %c0_64 = arith.constant 0 : index
    %250 = vector.load %arg4[%c0_63, %c0_64] : memref<128x512xf32, #tpu.memory_space<vmem>>, vector<128x512xf32>
    %cst_65 = arith.constant dense<0.000000e+00> : vector<8x512xf32>
    %251 = tpu.matmul %238, %250, %cst_65 {dimension_numbers = #tpu.dot_dimension_numbers<[1], [0], [0], [1], [0, 0, 1, 1], [], []>} : vector<8x128xf32>, vector<128x512xf32>, vector<8x512xf32> -> vector<8x512xf32>
    %252 = arith.addf %249, %251 : vector<8x512xf32>
    %253 = vector.extract_strided_slice %252 {offsets = [0, 0], sizes = [8, 128], strides = [1, 1]} : vector<8x512xf32> to vector<8x128xf32>
    %254 = arith.negf %253 : vector<8x128xf32>
    %255 = math.exp %254 : vector<8x128xf32>
    %cst_66 = arith.constant 1.000000e+00 : f32
    %256 = vector.broadcast %cst_66 : f32 to vector<8x128xf32>
    %257 = arith.addf %256, %255 : vector<8x128xf32>
    %258 = arith.divf %256, %257 : vector<8x128xf32>
    %259 = vector.extract_strided_slice %252 {offsets = [0, 128], sizes = [8, 128], strides = [1, 1]} : vector<8x512xf32> to vector<8x128xf32>
    %260 = arith.negf %259 : vector<8x128xf32>
    %261 = math.exp %260 : vector<8x128xf32>
    %cst_67 = arith.constant 1.000000e+00 : f32
    %262 = vector.broadcast %cst_67 : f32 to vector<8x128xf32>
    %263 = arith.addf %262, %261 : vector<8x128xf32>
    %264 = arith.divf %262, %263 : vector<8x128xf32>
    %265 = vector.extract_strided_slice %252 {offsets = [0, 256], sizes = [8, 128], strides = [1, 1]} : vector<8x512xf32> to vector<8x128xf32>
    %266 = math.tanh %265 : vector<8x128xf32>
    %267 = vector.extract_strided_slice %252 {offsets = [0, 384], sizes = [8, 128], strides = [1, 1]} : vector<8x512xf32> to vector<8x128xf32>
    %268 = arith.negf %267 : vector<8x128xf32>
    %269 = math.exp %268 : vector<8x128xf32>
    %cst_68 = arith.constant 1.000000e+00 : f32
    %270 = vector.broadcast %cst_68 : f32 to vector<8x128xf32>
    %271 = arith.addf %270, %269 : vector<8x128xf32>
    %272 = arith.divf %270, %271 : vector<8x128xf32>
    %273 = arith.mulf %264, %235 : vector<8x128xf32>
    %274 = arith.mulf %258, %266 : vector<8x128xf32>
    %275 = arith.addf %273, %274 : vector<8x128xf32>
    %276 = math.tanh %275 : vector<8x128xf32>
    %277 = arith.mulf %272, %276 : vector<8x128xf32>
    %278 = arith.addi %4, %c5_i32 : i32
    %279 = vector.broadcast %278 : i32 to vector<8x1xi32>
    %280 = arith.cmpi slt, %279, %3 : vector<8x1xi32>
    %281 = vector.shape_cast %280 : vector<8x1xi1> to vector<8x1xi1>
    %282 = vector.broadcast %281 : vector<8x1xi1> to vector<8x128xi1>
    %283 = arith.select %282, %275, %235 : vector<8x128xi1>, vector<8x128xf32>
    %284 = vector.shape_cast %280 : vector<8x1xi1> to vector<8x1xi1>
    %285 = vector.broadcast %284 : vector<8x1xi1> to vector<8x128xi1>
    %286 = arith.select %285, %277, %238 : vector<8x128xi1>, vector<8x128xf32>
    %cst_69 = arith.constant 0.000000e+00 : f32
    %287 = vector.broadcast %cst_69 : f32 to vector<8x128xf32>
    %288 = vector.shape_cast %280 : vector<8x1xi1> to vector<8x1xi1>
    %289 = vector.broadcast %288 : vector<8x1xi1> to vector<8x128xi1>
    %290 = arith.select %289, %277, %287 : vector<8x128xi1>, vector<8x128xf32>
    %291 = arith.index_cast %c5_i32 : i32 to index
    %c0_70 = arith.constant 0 : index
    %c0_71 = arith.constant 0 : index
    %292 = vector.load %arg5[%291, %c0_70, %c0_71] : memref<8x8x128xf32, #tpu.memory_space<vmem>>, vector<1x8x128xf32>
    %293 = vector.shape_cast %292 : vector<1x8x128xf32> to vector<8x128xf32>
    %294 = vector.shape_cast %290 : vector<8x128xf32> to vector<1x8x128xf32>
    tpu.vector_store %arg5[%291, %c0_70, %c0_71], %294 {strides = array<i32>} : memref<8x8x128xf32, #tpu.memory_space<vmem>>, vector<1x8x128xf32>,
    %c6_i32 = arith.constant 6 : i32
    %295 = arith.index_cast %c6_i32 : i32 to index
    %c0_72 = arith.constant 0 : index
    %c0_73 = arith.constant 0 : index
    %296 = vector.load %arg3[%295, %c0_72, %c0_73] : memref<8x8x512xf32, #tpu.memory_space<vmem>>, vector<1x8x512xf32>
    %297 = vector.shape_cast %296 : vector<1x8x512xf32> to vector<8x512xf32>
    %c0_74 = arith.constant 0 : index
    %c0_75 = arith.constant 0 : index
    %298 = vector.load %arg4[%c0_74, %c0_75] : memref<128x512xf32, #tpu.memory_space<vmem>>, vector<128x512xf32>
    %cst_76 = arith.constant dense<0.000000e+00> : vector<8x512xf32>
    %299 = tpu.matmul %286, %298, %cst_76 {dimension_numbers = #tpu.dot_dimension_numbers<[1], [0], [0], [1], [0, 0, 1, 1], [], []>} : vector<8x128xf32>, vector<128x512xf32>, vector<8x512xf32> -> vector<8x512xf32>
    %300 = arith.addf %297, %299 : vector<8x512xf32>
    %301 = vector.extract_strided_slice %300 {offsets = [0, 0], sizes = [8, 128], strides = [1, 1]} : vector<8x512xf32> to vector<8x128xf32>
    %302 = arith.negf %301 : vector<8x128xf32>
    %303 = math.exp %302 : vector<8x128xf32>
    %cst_77 = arith.constant 1.000000e+00 : f32
    %304 = vector.broadcast %cst_77 : f32 to vector<8x128xf32>
    %305 = arith.addf %304, %303 : vector<8x128xf32>
    %306 = arith.divf %304, %305 : vector<8x128xf32>
    %307 = vector.extract_strided_slice %300 {offsets = [0, 128], sizes = [8, 128], strides = [1, 1]} : vector<8x512xf32> to vector<8x128xf32>
    %308 = arith.negf %307 : vector<8x128xf32>
    %309 = math.exp %308 : vector<8x128xf32>
    %cst_78 = arith.constant 1.000000e+00 : f32
    %310 = vector.broadcast %cst_78 : f32 to vector<8x128xf32>
    %311 = arith.addf %310, %309 : vector<8x128xf32>
    %312 = arith.divf %310, %311 : vector<8x128xf32>
    %313 = vector.extract_strided_slice %300 {offsets = [0, 256], sizes = [8, 128], strides = [1, 1]} : vector<8x512xf32> to vector<8x128xf32>
    %314 = math.tanh %313 : vector<8x128xf32>
    %315 = vector.extract_strided_slice %300 {offsets = [0, 384], sizes = [8, 128], strides = [1, 1]} : vector<8x512xf32> to vector<8x128xf32>
    %316 = arith.negf %315 : vector<8x128xf32>
    %317 = math.exp %316 : vector<8x128xf32>
    %cst_79 = arith.constant 1.000000e+00 : f32
    %318 = vector.broadcast %cst_79 : f32 to vector<8x128xf32>
    %319 = arith.addf %318, %317 : vector<8x128xf32>
    %320 = arith.divf %318, %319 : vector<8x128xf32>
    %321 = arith.mulf %312, %283 : vector<8x128xf32>
    %322 = arith.mulf %306, %314 : vector<8x128xf32>
    %323 = arith.addf %321, %322 : vector<8x128xf32>
    %324 = math.tanh %323 : vector<8x128xf32>
    %325 = arith.mulf %320, %324 : vector<8x128xf32>
    %326 = arith.addi %4, %c6_i32 : i32
    %327 = vector.broadcast %326 : i32 to vector<8x1xi32>
    %328 = arith.cmpi slt, %327, %3 : vector<8x1xi32>
    %329 = vector.shape_cast %328 : vector<8x1xi1> to vector<8x1xi1>
    %330 = vector.broadcast %329 : vector<8x1xi1> to vector<8x128xi1>
    %331 = arith.select %330, %323, %283 : vector<8x128xi1>, vector<8x128xf32>
    %332 = vector.shape_cast %328 : vector<8x1xi1> to vector<8x1xi1>
    %333 = vector.broadcast %332 : vector<8x1xi1> to vector<8x128xi1>
    %334 = arith.select %333, %325, %286 : vector<8x128xi1>, vector<8x128xf32>
    %cst_80 = arith.constant 0.000000e+00 : f32
    %335 = vector.broadcast %cst_80 : f32 to vector<8x128xf32>
    %336 = vector.shape_cast %328 : vector<8x1xi1> to vector<8x1xi1>
    %337 = vector.broadcast %336 : vector<8x1xi1> to vector<8x128xi1>
    %338 = arith.select %337, %325, %335 : vector<8x128xi1>, vector<8x128xf32>
    %339 = arith.index_cast %c6_i32 : i32 to index
    %c0_81 = arith.constant 0 : index
    %c0_82 = arith.constant 0 : index
    %340 = vector.load %arg5[%339, %c0_81, %c0_82] : memref<8x8x128xf32, #tpu.memory_space<vmem>>, vector<1x8x128xf32>
    %341 = vector.shape_cast %340 : vector<1x8x128xf32> to vector<8x128xf32>
    %342 = vector.shape_cast %338 : vector<8x128xf32> to vector<1x8x128xf32>
    tpu.vector_store %arg5[%339, %c0_81, %c0_82], %342 {strides = array<i32>} : memref<8x8x128xf32, #tpu.memory_space<vmem>>, vector<1x8x128xf32>,
    %c7_i32 = arith.constant 7 : i32
    %343 = arith.index_cast %c7_i32 : i32 to index
    %c0_83 = arith.constant 0 : index
    %c0_84 = arith.constant 0 : index
    %344 = vector.load %arg3[%343, %c0_83, %c0_84] : memref<8x8x512xf32, #tpu.memory_space<vmem>>, vector<1x8x512xf32>
    %345 = vector.shape_cast %344 : vector<1x8x512xf32> to vector<8x512xf32>
    %c0_85 = arith.constant 0 : index
    %c0_86 = arith.constant 0 : index
    %346 = vector.load %arg4[%c0_85, %c0_86] : memref<128x512xf32, #tpu.memory_space<vmem>>, vector<128x512xf32>
    %cst_87 = arith.constant dense<0.000000e+00> : vector<8x512xf32>
    %347 = tpu.matmul %334, %346, %cst_87 {dimension_numbers = #tpu.dot_dimension_numbers<[1], [0], [0], [1], [0, 0, 1, 1], [], []>} : vector<8x128xf32>, vector<128x512xf32>, vector<8x512xf32> -> vector<8x512xf32>
    %348 = arith.addf %345, %347 : vector<8x512xf32>
    %349 = vector.extract_strided_slice %348 {offsets = [0, 0], sizes = [8, 128], strides = [1, 1]} : vector<8x512xf32> to vector<8x128xf32>
    %350 = arith.negf %349 : vector<8x128xf32>
    %351 = math.exp %350 : vector<8x128xf32>
    %cst_88 = arith.constant 1.000000e+00 : f32
    %352 = vector.broadcast %cst_88 : f32 to vector<8x128xf32>
    %353 = arith.addf %352, %351 : vector<8x128xf32>
    %354 = arith.divf %352, %353 : vector<8x128xf32>
    %355 = vector.extract_strided_slice %348 {offsets = [0, 128], sizes = [8, 128], strides = [1, 1]} : vector<8x512xf32> to vector<8x128xf32>
    %356 = arith.negf %355 : vector<8x128xf32>
    %357 = math.exp %356 : vector<8x128xf32>
    %cst_89 = arith.constant 1.000000e+00 : f32
    %358 = vector.broadcast %cst_89 : f32 to vector<8x128xf32>
    %359 = arith.addf %358, %357 : vector<8x128xf32>
    %360 = arith.divf %358, %359 : vector<8x128xf32>
    %361 = vector.extract_strided_slice %348 {offsets = [0, 256], sizes = [8, 128], strides = [1, 1]} : vector<8x512xf32> to vector<8x128xf32>
    %362 = math.tanh %361 : vector<8x128xf32>
    %363 = vector.extract_strided_slice %348 {offsets = [0, 384], sizes = [8, 128], strides = [1, 1]} : vector<8x512xf32> to vector<8x128xf32>
    %364 = arith.negf %363 : vector<8x128xf32>
    %365 = math.exp %364 : vector<8x128xf32>
    %cst_90 = arith.constant 1.000000e+00 : f32
    %366 = vector.broadcast %cst_90 : f32 to vector<8x128xf32>
    %367 = arith.addf %366, %365 : vector<8x128xf32>
    %368 = arith.divf %366, %367 : vector<8x128xf32>
    %369 = arith.mulf %360, %331 : vector<8x128xf32>
    %370 = arith.mulf %354, %362 : vector<8x128xf32>
    %371 = arith.addf %369, %370 : vector<8x128xf32>
    %372 = math.tanh %371 : vector<8x128xf32>
    %373 = arith.mulf %368, %372 : vector<8x128xf32>
    %374 = arith.addi %4, %c7_i32 : i32
    %375 = vector.broadcast %374 : i32 to vector<8x1xi32>
    %376 = arith.cmpi slt, %375, %3 : vector<8x1xi32>
    %377 = vector.shape_cast %376 : vector<8x1xi1> to vector<8x1xi1>
    %378 = vector.broadcast %377 : vector<8x1xi1> to vector<8x128xi1>
    %379 = arith.select %378, %371, %331 : vector<8x128xi1>, vector<8x128xf32>
    %380 = vector.shape_cast %376 : vector<8x1xi1> to vector<8x1xi1>
    %381 = vector.broadcast %380 : vector<8x1xi1> to vector<8x128xi1>
    %382 = arith.select %381, %373, %334 : vector<8x128xi1>, vector<8x128xf32>
    %cst_91 = arith.constant 0.000000e+00 : f32
    %383 = vector.broadcast %cst_91 : f32 to vector<8x128xf32>
    %384 = vector.shape_cast %376 : vector<8x1xi1> to vector<8x1xi1>
    %385 = vector.broadcast %384 : vector<8x1xi1> to vector<8x128xi1>
    %386 = arith.select %385, %373, %383 : vector<8x128xi1>, vector<8x128xf32>
    %387 = arith.index_cast %c7_i32 : i32 to index
    %c0_92 = arith.constant 0 : index
    %c0_93 = arith.constant 0 : index
    %388 = vector.load %arg5[%387, %c0_92, %c0_93] : memref<8x8x128xf32, #tpu.memory_space<vmem>>, vector<1x8x128xf32>
    %389 = vector.shape_cast %388 : vector<1x8x128xf32> to vector<8x128xf32>
    %390 = vector.shape_cast %386 : vector<8x128xf32> to vector<1x8x128xf32>
    tpu.vector_store %arg5[%387, %c0_92, %c0_93], %390 {strides = array<i32>} : memref<8x8x128xf32, #tpu.memory_space<vmem>>, vector<1x8x128xf32>,
    %c8_i32_94 = arith.constant 8 : i32
    %c0_95 = arith.constant 0 : index
    %c0_96 = arith.constant 0 : index
    %391 = vector.load %arg6[%c0_95, %c0_96] : memref<8x128xf32, #tpu.memory_space<vmem>>, vector<8x128xf32>
    tpu.vector_store %arg6[%c0_95, %c0_96], %382 {strides = array<i32>} : memref<8x128xf32, #tpu.memory_space<vmem>>, vector<8x128xf32>,
    %c0_97 = arith.constant 0 : index
    %c0_98 = arith.constant 0 : index
    %392 = vector.load %arg7[%c0_97, %c0_98] : memref<8x128xf32, #tpu.memory_space<vmem>>, vector<8x128xf32>
    tpu.vector_store %arg7[%c0_97, %c0_98], %379 {strides = array<i32>} : memref<8x128xf32, #tpu.memory_space<vmem>>, vector<8x128xf32>,
    return
  }
  func.func @transform_0(%arg0: i32, %arg1: i32) -> (i32, i32) {
    %c0_i32 = arith.constant 0 : i32
    %c0_i32_0 = arith.constant 0 : i32
    return %arg0, %c0_i32 : i32, i32
  }
  func.func @transform_1(%arg0: i32, %arg1: i32) -> (i32, i32, i32) {
    %c0_i32 = arith.constant 0 : i32
    %c0_i32_0 = arith.constant 0 : i32
    return %arg1, %arg0, %c0_i32 : i32, i32, i32
  }
  func.func @transform_2(%arg0: i32, %arg1: i32) -> (i32, i32) {
    %c0_i32 = arith.constant 0 : i32
    %c0_i32_0 = arith.constant 0 : i32
    %c0_i32_1 = arith.constant 0 : i32
    return %c0_i32, %c0_i32_0 : i32, i32
  }
  func.func @transform_3(%arg0: i32, %arg1: i32) -> (i32, i32, i32) {
    %c0_i32 = arith.constant 0 : i32
    %c0_i32_0 = arith.constant 0 : i32
    return %arg1, %arg0, %c0_i32 : i32, i32, i32
  }
}

</mosaic_0001>

<bundles_post_ra>
// kernel: rnn_per_tstep_binary_classifier.1
= control target key start
LH: loop header
LB: loop body
LE: loop exit
PB: predicated region body
PF: predicated region fallthrough
CT: control target
= control target key end

     0   :  { %s2447_s12 = smov 0   ;;  %s2449_s13 = smov 0   ;;  %s4201_s0 = inlined_call_operand.vmem [shape: s32[8,1], index: 0, kind: input, shape index: {}]   ;;  %s4202_s1 = inlined_call_operand.vmem [shape: f32[16,8,512], index: 1, kind: input, shape index: {}]   ;;  %s4203_s2 = inlined_call_operand.vmem [shape: f32[128,512], index: 2, kind: input, shape index: {}]   ;;  %s4204_s3 = inlined_call_operand.vmem [shape: f32[16,8,128], index: 3, kind: output, shape index: {}]  }
   0x1   :  { %s2451_s14 = smov 0  }
   0x2 LB: > { %s22_s15 = sadd.s32 1, %s2419_s13  ;;  %p2173_p0 = scmp.ge.s32.totalorder %s2423_s14, 1  ;;  %s2423_s14 = sphi %s2451_s14, %s13_s14   ;;  %s2419_s13 = sphi %s2449_s13, %s4335_s13   ;;  %s2415_s12 = sphi %s2447_s12, %s4334_s12  }
   0x3   : > { %p23_p1 = scmp.ge.s32.totalorder %s22_s15, 2  ;;  %p168_p2 = scmp.lt.s32.totalorder %s2423_s14, 3 }
   0x5   : > { %s4337_s15 = smov (%p23_p1, %s22_s15), 0  ;;  %p169_p3 = pnand %p2173_p0, %p168_p2 }
   0x7   : > { %172 = sbr.rel (%p169_p3) target bundleno = 1424 (0x590), region = 32 }
   0xc   : > { %s2465_s16 = sshll.u32 %s2415_s12, 3  ;;  %p2179_p5 = scmp.ne.s32.totalorder %s2415_s12, 0 }
   0xd   : > { %p209_p4 = scmp.lt.s32.totalorder %s2465_s16, 15 }
   0xe   : > { %231 = sbr.rel (%p2179_p5) target bundleno = 22 (0x16), region = 36 }
   0xf   : > { %s210_s17 = scalar_select %p209_p4, %s2465_s16, 15 }
  0x11   : > { %s2242_s18 = sshll.u32 %s210_s17, 5  ;;  %s2178_s19 = sshll.u32 %s210_s17, 3 }
  0x12   : > { %s2472_s22 = scalar_lea.vmem %s4202_s1, %s2242_s18  ;;  %s2477_s25 = scalar_lea.vmem %s4204_s3, %s2178_s19 }
  0x13   : > { %v2425_v0 = vmov 0.0  }
  0x14   : > { %232 = vst [vmem:[#allocation2] sm:$0xff] %v2425_v0 }
  0x15   : > { %233 = vst [vmem:[#allocation3] sm:$0xff] %v2425_v0 }
  0x16 PF: > { %v2482_v1 = vld [vmem:[%s4203_s2 + $0x1e0] sm:$0xff]  ;;  %v2487_v2 = vld [vmem:[%s4203_s2 + $0x1e8] sm:$0xff]  ;;  %v2492_v3 = vld [vmem:[%s4203_s2 + $0x1f8] sm:$0xff]  ;;  %v453_v56 = vstv %s2465_s16  ;;  %s680_s20 = sadd.s32 1, %s2465_s16  ;;  %v4214_v0 = vmov 0   ;;  %s1825_s4 = sadd.s32 6, %s2465_s16 }
  0x17   : > { %306 = vmatpush.msra.mxu0 %v2482_v1  ;;  %326 = vmatpush.msra.mxu1 %v2487_v2  ;;  %v2499_v4 = vld [vmem:[%s4203_s2 + $0x1c0] sm:$0xff]  ;;  %v2504_v5 = vld [vmem:[%s4203_s2 + $0x1c8] sm:$0xff]  ;;  %v2509_v6 = vld [vmem:[%s4203_s2 + $0x1d8] sm:$0xff]  ;;  %s909_s5 = sadd.s32 2, %s2465_s16  ;;  %s1138_s6 = sadd.s32 3, %s2465_s16 }
  0x18   : > { %4258 = vst [vmem:[#allocation4_spill] sm:$0xff] %v2504_v5  ;;  %366 = vmatpush.msra.mxu3 %v2492_v3  ;;  %v2515_v7 = vld [vmem:[%s4203_s2 + $0x1a0] sm:$0xff]  ;;  %v2520_v8 = vld [vmem:[%s4203_s2 + $0x1a8] sm:$0xff]  ;;  %v2527_v9 = vld [vmem:[%s4203_s2 + $0x1b8] sm:$0xff]  ;;  %2269 = vset.pattern.permute.xlu0 %v4214_v0  ;;  %s2054_s7 = sadd.s32 7, %s2465_s16  ;;  %s1367_s10 = sadd.s32 4, %s2465_s16 }
  0x19   : > { %307 = vmatpush.msra.mxu0 %v2499_v4  ;;  %327 = vmatpush.msra.mxu1 %v2504_v5  ;;  %v2533_v10 = vld [vmem:[%s4203_s2 + $0x180] sm:$0xff]  ;;  %v2538_v11 = vld [vmem:[%s4203_s2 + $0x188] sm:$0xff]  ;;  %v2545_v12 = vld [vmem:[%s4203_s2 + $0x198] sm:$0xff]  ;;  %s1596_s11 = sadd.s32 5, %s2465_s16 }
  0x1a   : > { %367 = vmatpush.msra.mxu3 %v2509_v6  ;;  %v2551_v13 = vld [vmem:[%s4203_s2 + $0x160] sm:$0xff]  ;;  %v2556_v14 = vld [vmem:[%s4203_s2 + $0x168] sm:$0xff]  ;;  %v2563_v15 = vld [vmem:[%s4203_s2 + $0x178] sm:$0xff] }
  0x1b   : > { %308 = vmatpush.msra.mxu0 %v2515_v7  ;;  %328 = vmatpush.msra.mxu1 %v2520_v8  ;;  %v2569_v16 = vld [vmem:[%s4203_s2 + $0x140] sm:$0xff]  ;;  %v2574_v17 = vld [vmem:[%s4203_s2 + $0x148] sm:$0xff]  ;;  %v2579_v18 = vld [vmem:[%s4203_s2 + $0x1f0] sm:$0xff] }
  0x1c   : > { %368 = vmatpush.msra.mxu3 %v2527_v9  ;;  %v2586_v19 = vld [vmem:[%s4203_s2 + $0x158] sm:$0xff]  ;;  %v2591_v20 = vld [vmem:[%s4203_s2 + $0x1d0] sm:$0xff]  ;;  %v2597_v21 = vld [vmem:[%s4203_s2 + $0x120] sm:$0xff]  ;;  %346 = vmatpush.msra.mxu2 %v2579_v18 }
  0x1d   : > { %309 = vmatpush.msra.mxu0 %v2533_v10  ;;  %329 = vmatpush.msra.mxu1 %v2538_v11  ;;  %v2602_v22 = vld [vmem:[%s4203_s2 + $0x128] sm:$0xff]  ;;  %v2610_v23 = vld [vmem:[%s4203_s2 + $0x138] sm:$0xff]  ;;  %v2615_v24 = vld [vmem:[%s4203_s2 + $0x1b0] sm:$0xff] }
  0x1e   : > { %369 = vmatpush.msra.mxu3 %v2545_v12  ;;  %v2621_v25 = vld [vmem:[%s4203_s2 + $0x100] sm:$0xff]  ;;  %v2626_v26 = vld [vmem:[%s4203_s2 + $0x108] sm:$0xff]  ;;  %347 = vmatpush.msra.mxu2 %v2591_v20  ;;  %v2634_v27 = vld [vmem:[%s4203_s2 + $0x118] sm:$0xff] }
  0x1f   : > { %310 = vmatpush.msra.mxu0 %v2551_v13  ;;  %330 = vmatpush.msra.mxu1 %v2556_v14  ;;  %v2639_v28 = vld [vmem:[%s4203_s2 + $0x190] sm:$0xff]  ;;  %v2645_v29 = vld [vmem:[%s4203_s2 + $0xe0] sm:$0xff]  ;;  %v2650_v30 = vld [vmem:[%s4203_s2 + $0xe8] sm:$0xff] }
  0x20   : > { %370 = vmatpush.msra.mxu3 %v2563_v15  ;;  %348 = vmatpush.msra.mxu2 %v2615_v24  ;;  %v2658_v31 = vld [vmem:[%s4203_s2 + $0xf8] sm:$0xff]  ;;  %v2663_v32 = vld [vmem:[%s4203_s2 + $0x170] sm:$0xff]  ;;  %v2669_v33 = vld [vmem:[%s4203_s2 + $0xc0] sm:$0xff] }
  0x21   : > { %311 = vmatpush.msra.mxu0 %v2569_v16  ;;  %331 = vmatpush.msra.mxu1 %v2574_v17  ;;  %v2674_v34 = vld [vmem:[%s4203_s2 + $0xc8] sm:$0xff]  ;;  %v2682_v35 = vld [vmem:[%s4203_s2 + $0xd8] sm:$0xff]  ;;  %v2687_v36 = vld [vmem:[%s4203_s2 + $0x150] sm:$0xff] }
  0x22   : > { %371 = vmatpush.msra.mxu3 %v2586_v19  ;;  %349 = vmatpush.msra.mxu2 %v2639_v28  ;;  %v2693_v37 = vld [vmem:[%s4203_s2 + $0xa0] sm:$0xff]  ;;  %v2698_v38 = vld [vmem:[%s4203_s2 + $0xa8] sm:$0xff]  ;;  %v2706_v39 = vld [vmem:[%s4203_s2 + $0xb8] sm:$0xff] }
  0x23   : > { %312 = vmatpush.msra.mxu0 %v2597_v21  ;;  %332 = vmatpush.msra.mxu1 %v2602_v22  ;;  %v2711_v40 = vld [vmem:[%s4203_s2 + $0x130] sm:$0xff]  ;;  %v2717_v41 = vld [vmem:[%s4203_s2 + $0x80] sm:$0xff]  ;;  %v2722_v42 = vld [vmem:[%s4203_s2 + $0x88] sm:$0xff] }
  0x24   : > { %372 = vmatpush.msra.mxu3 %v2610_v23  ;;  %350 = vmatpush.msra.mxu2 %v2663_v32  ;;  %v2730_v43 = vld [vmem:[%s4203_s2 + $0x98] sm:$0xff]  ;;  %v2735_v44 = vld [vmem:[%s4203_s2 + $0x110] sm:$0xff]  ;;  %v2741_v45 = vld [vmem:[%s4203_s2 + $0x60] sm:$0xff] }
  0x25   : > { %313 = vmatpush.msra.mxu0 %v2621_v25  ;;  %333 = vmatpush.msra.mxu1 %v2626_v26  ;;  %v2746_v46 = vld [vmem:[%s4203_s2 + $0x68] sm:$0xff]  ;;  %v2754_v47 = vld [vmem:[%s4203_s2 + $0x78] sm:$0xff]  ;;  %v2759_v48 = vld [vmem:[%s4203_s2 + $0xf0] sm:$0xff] }
  0x26   : > { %373 = vmatpush.msra.mxu3 %v2634_v27  ;;  %351 = vmatpush.msra.mxu2 %v2687_v36  ;;  %v2765_v49 = vld [vmem:[%s4203_s2 + $0x40] sm:$0xff]  ;;  %v2770_v50 = vld [vmem:[%s4203_s2 + $0x48] sm:$0xff]  ;;  %v2778_v51 = vld [vmem:[%s4203_s2 + $0x58] sm:$0xff] }
  0x27   : > { %314 = vmatpush.msra.mxu0 %v2645_v29  ;;  %334 = vmatpush.msra.mxu1 %v2650_v30  ;;  %v2783_v52 = vld [vmem:[%s4203_s2 + $0xd0] sm:$0xff]  ;;  %v2789_v53 = vld [vmem:[%s4203_s2 + $0x20] sm:$0xff]  ;;  %v2794_v54 = vld [vmem:[%s4203_s2 + $0x28] sm:$0xff] }
  0x28   : > { %374 = vmatpush.msra.mxu3 %v2658_v31  ;;  %352 = vmatpush.msra.mxu2 %v2711_v40  ;;  %v2800_v55 = vld [vmem:[%s4201_s0] sm:$0xff]  ;;  %v2808_v57 = vld [vmem:[%s4203_s2 + $0x38] sm:$0xff]  ;;  %v2813_v58 = vld [vmem:[%s4203_s2 + $0xb0] sm:$0xff] }
  0x29   : > { %315 = vmatpush.msra.mxu0 %v2669_v33  ;;  %335 = vmatpush.msra.mxu1 %v2674_v34  ;;  %4259 = vst [vmem:[#allocation5_spill] sm:$0xff] %v2800_v55  ;;  %v2819_v59 = vld [vmem:[%s4203_s2] sm:$0xff]  ;;  %v2824_v60 = vld [vmem:[%s4203_s2 + $0x8] sm:$0xff]  ;;  %v2832_v61 = vld [vmem:[%s4203_s2 + $0x18] sm:$0xff]  ;;  %vm454_vm0 = vcmp.lt.s32.totalorder %v453_v56, %v2800_v55 }
  0x2a   : > { %375 = vmatpush.msra.mxu3 %v2682_v35  ;;  %353 = vmatpush.msra.mxu2 %v2735_v44  ;;  %4260 = vst [vmem:[#allocation6_spill] sm:$0xff] %v2808_v57  ;;  %v2834_v62 = vld [vmem:[#allocation2] sm:$0xff]  ;;  %v2844_v63 = vld [vmem:[%s4203_s2 + $0x90] sm:$0xff]  ;;  %v455_v56 = vsel %vm454_vm0, 1, %v4214_v0 }
  0x2b   : > { %316 = vmatpush.msra.mxu0 %v2693_v37  ;;  %336 = vmatpush.msra.mxu1 %v2698_v38  ;;  %4261 = vst [vmem:[#allocation7_spill] sm:$0xff] %v2819_v59 }
  0x2c   : > { %376 = vmatpush.msra.mxu3 %v2706_v39  ;;  %354 = vmatpush.msra.mxu2 %v2759_v48  ;;  %4262 = vst [vmem:[#allocation8_spill] sm:$0xff] %v2824_v60 }
  0x2d   : > { %317 = vmatpush.msra.mxu0 %v2717_v41  ;;  %337 = vmatpush.msra.mxu1 %v2722_v42  ;;  %4263 = vst [vmem:[#allocation9_spill] sm:$0xff] %v2832_v61 }
  0x2e   : > { %377 = vmatpush.msra.mxu3 %v2730_v43  ;;  %355 = vmatpush.msra.mxu2 %v2783_v52  ;;  %4264 = vst [vmem:[#allocation10_spill] sm:$0xff] %v2834_v62 }
  0x2f   : > { %318 = vmatpush.msra.mxu0 %v2741_v45  ;;  %338 = vmatpush.msra.mxu1 %v2746_v46 }
  0x30   : > { %378 = vmatpush.msra.mxu3 %v2754_v47  ;;  %356 = vmatpush.msra.mxu2 %v2813_v58 }
  0x31   : > { %319 = vmatpush.msra.mxu0 %v2765_v49  ;;  %339 = vmatpush.msra.mxu1 %v2770_v50 }
  0x32   : > { %379 = vmatpush.msra.mxu3 %v2778_v51  ;;  %357 = vmatpush.msra.mxu2 %v2844_v63 }
  0x33   : > { %320 = vmatpush.msra.mxu0 %v2789_v53  ;;  %340 = vmatpush.msra.mxu1 %v2794_v54 }
  0x34   : > { %380 = vmatpush.msra.mxu3 %v2808_v57  ;;  %457 = vperm.xlu0 %2269, %v455_v56   ;;  %v2870_v57 = vld [vmem:[%s4203_s2 + $0x30] sm:$0xff] }
  0x35   : > { %321 = vmatpush.msra.mxu0 %v2819_v59  ;;  %341 = vmatpush.msra.mxu1 %v2824_v60  ;;  %v2855_v60 = vld [vmem:[%s4203_s2 + $0x70] sm:$0xff] }
  0x36   : > { %381 = vmatpush.msra.mxu3 %v2832_v61  ;;  %322 = vmatmul.f32.vlgmr.msra.gmra.mxu0 %v2834_v62  ;;  %v681_v61 = vstv %s680_s20  ;;  %v2862_v59 = vld [vmem:[%s4203_s2 + $0x50] sm:$0xff] }
  0x37   : > { %342 = vmatmul.f32.vlgmr.msra.gmra.mxu1 %v2834_v62  ;;  %382 = vmatmul.f32.vlgmr.msra.gmra.mxu3 %v2834_v62  ;;  %vm682_vm1 = vcmp.lt.s32.totalorder %v681_v61, %v2800_v55  ;;  %v2880_v56 = vld [vmem:[%s4203_s2 + $0x10] sm:$0xff] }
  0x38   : > { %533 = vmatpush.msrb.mxu0 %v2482_v1  ;;  %358 = vmatpush.msra.mxu2 %v2855_v60  ;;  %v683_v61 = vsel %vm682_vm1, 1, %v4214_v0 }
  0x39   : > { %553 = vmatpush.msrb.mxu1 %v2487_v2  ;;  %593 = vmatpush.msrb.mxu3 %v2492_v3 }
  0x3a   : > { %534 = vmatpush.msrb.mxu0 %v2499_v4  ;;  %359 = vmatpush.msra.mxu2 %v2862_v59 }
  0x3b   : > { %554 = vmatpush.msrb.mxu1 %v2504_v5  ;;  %594 = vmatpush.msrb.mxu3 %v2509_v6  ;;  %v1826_v5 = vstv %s1825_s4 }
  0x3c   : > { %535 = vmatpush.msrb.mxu0 %v2515_v7  ;;  %360 = vmatpush.msra.mxu2 %v2870_v57  ;;  %vm1827_vm2 = vcmp.lt.s32.totalorder %v1826_v5, %v2800_v55  ;;  %v4265_v5 = vld [vmem:[#allocation6_spill] sm:$0xff]  ;;  %v4268_v55 = vld [vmem:[#allocation9_spill] sm:$0xff] }
  0x3d   : > { %555 = vmatpush.msrb.mxu1 %v2520_v8  ;;  %595 = vmatpush.msrb.mxu3 %v2527_v9 }
  0x3e   : > { %536 = vmatpush.msrb.mxu0 %v2533_v10  ;;  %361 = vmatpush.msra.mxu2 %v2880_v56 }
  0x3f   : > { %556 = vmatpush.msrb.mxu1 %v2538_v11  ;;  %362 = vmatmul.f32.vlgmr.msra.gmra.mxu2 %v2834_v62  ;;  %v4269_v62 = vld [vmem:[#allocation4_spill] sm:$0xff] }
  0x40   : > { %685 = vperm.xlu0 %2269, %v683_v61   ;;  %573 = vmatpush.msrb.mxu2 %v2579_v18  ;;  %v1828_v61 = vsel %vm1827_vm2, 1, %v4214_v0  ;;  %v4267_v0 = vld [vmem:[#allocation8_spill] sm:$0xff] }
  0x41   : > { %596 = vmatpush.msrb.mxu3 %v2545_v12  ;;  %537 = vmatpush.msrb.mxu0 %v2551_v13 }
  0x42   : > { %557 = vmatpush.msrb.mxu1 %v2556_v14  ;;  %574 = vmatpush.msrb.mxu2 %v2591_v20 }
  0x43   : > { %597 = vmatpush.msrb.mxu3 %v2563_v15  ;;  %538 = vmatpush.msrb.mxu0 %v2569_v16 }
  0x44   : > { %558 = vmatpush.msrb.mxu1 %v2574_v17  ;;  %575 = vmatpush.msrb.mxu2 %v2615_v24 }
  0x45   : > { %598 = vmatpush.msrb.mxu3 %v2586_v19  ;;  %539 = vmatpush.msrb.mxu0 %v2597_v21 }
  0x46   : > { %559 = vmatpush.msrb.mxu1 %v2602_v22  ;;  %576 = vmatpush.msrb.mxu2 %v2639_v28 }
  0x47   : > { %599 = vmatpush.msrb.mxu3 %v2610_v23  ;;  %540 = vmatpush.msrb.mxu0 %v2621_v25 }
  0x48   : > { %1830 = vperm.xlu0 %2269, %v1828_v61   ;;  %577 = vmatpush.msrb.mxu2 %v2663_v32  ;;  %v4266_v61 = vld [vmem:[#allocation7_spill] sm:$0xff] }
  0x49   : > { %560 = vmatpush.msrb.mxu1 %v2626_v26  ;;  %600 = vmatpush.msrb.mxu3 %v2634_v27 }
  0x4a   : > { %541 = vmatpush.msrb.mxu0 %v2645_v29  ;;  %578 = vmatpush.msrb.mxu2 %v2687_v36 }
  0x4b   : > { %561 = vmatpush.msrb.mxu1 %v2650_v30  ;;  %601 = vmatpush.msrb.mxu3 %v2658_v31 }
  0x4c   : > { %542 = vmatpush.msrb.mxu0 %v2669_v33  ;;  %579 = vmatpush.msrb.mxu2 %v2711_v40 }
  0x4d   : > { %562 = vmatpush.msrb.mxu1 %v2674_v34  ;;  %602 = vmatpush.msrb.mxu3 %v2682_v35 }
  0x4e   : > { %543 = vmatpush.msrb.mxu0 %v2693_v37  ;;  %580 = vmatpush.msrb.mxu2 %v2735_v44 }
  0x4f   : > { %563 = vmatpush.msrb.mxu1 %v2698_v38  ;;  %603 = vmatpush.msrb.mxu3 %v2706_v39 }
  0x50   : > { %544 = vmatpush.msrb.mxu0 %v2717_v41  ;;  %581 = vmatpush.msrb.mxu2 %v2759_v48 }
  0x51   : > { %564 = vmatpush.msrb.mxu1 %v2722_v42  ;;  %604 = vmatpush.msrb.mxu3 %v2730_v43 }
  0x52   : > { %545 = vmatpush.msrb.mxu0 %v2741_v45  ;;  %582 = vmatpush.msrb.mxu2 %v2783_v52 }
  0x53   : > { %565 = vmatpush.msrb.mxu1 %v2746_v46  ;;  %605 = vmatpush.msrb.mxu3 %v2754_v47 }
  0x54   : > { %546 = vmatpush.msrb.mxu0 %v2765_v49  ;;  %583 = vmatpush.msrb.mxu2 %v2813_v58 }
  0x55   : > { %566 = vmatpush.msrb.mxu1 %v2770_v50  ;;  %606 = vmatpush.msrb.mxu3 %v2778_v51 }
  0x56   : > { %547 = vmatpush.msrb.mxu0 %v2789_v53  ;;  %584 = vmatpush.msrb.mxu2 %v2844_v63 }
  0x57   : > { %567 = vmatpush.msrb.mxu1 %v2794_v54  ;;  %607 = vmatpush.msrb.mxu3 %v4265_v5 }
  0x58   : > { %548 = vmatpush.msrb.mxu0 %v4266_v61  ;;  %585 = vmatpush.msrb.mxu2 %v2855_v60 }
  0x59   : > { %568 = vmatpush.msrb.mxu1 %v4267_v0  ;;  %608 = vmatpush.msrb.mxu3 %v4268_v55 }
  0x5a   : > { %762 = vmatpush.msra.mxu0 %v2482_v1  ;;  %586 = vmatpush.msrb.mxu2 %v2862_v59  ;;  %v4270_v1 = vmov 0  }
  0x5b   : > { %782 = vmatpush.msra.mxu1 %v2487_v2  ;;  %822 = vmatpush.msra.mxu3 %v2492_v3  ;;  %v238_v2 = vld [vmem:[%s2472_s22] sm:$0xff]  ;;  %v239_v3 = vld [vmem:[%s2472_s22 + $0x8] sm:$0xff] }
  0x5c   : > { %763 = vmatpush.msra.mxu0 %v2499_v4  ;;  %587 = vmatpush.msrb.mxu2 %v2870_v57 }
  0x5d   : > { %783 = vmatpush.msra.mxu1 %v4269_v62  ;;  %823 = vmatpush.msra.mxu3 %v2509_v6 }
  0x5e   : > { %764 = vmatpush.msra.mxu0 %v2515_v7  ;;  %588 = vmatpush.msrb.mxu2 %v2880_v56 }
  0x5f   : > { %784 = vmatpush.msra.mxu1 %v2520_v8  ;;  %824 = vmatpush.msra.mxu3 %v2527_v9 }
  0x60   : > { %802 = vmatpush.msra.mxu2 %v2579_v18  ;;  %765 = vmatpush.msra.mxu0 %v2533_v10 }
  0x61   : > { %785 = vmatpush.msra.mxu1 %v2538_v11  ;;  %825 = vmatpush.msra.mxu3 %v2545_v12  ;;  %v241_v11 = vld [vmem:[%s2472_s22 + $0x18] sm:$0xff] }
  0x62   : > { %803 = vmatpush.msra.mxu2 %v2591_v20  ;;  %766 = vmatpush.msra.mxu0 %v2551_v13 }
  0x63   : > { %786 = vmatpush.msra.mxu1 %v2556_v14  ;;  %826 = vmatpush.msra.mxu3 %v2563_v15 }
  0x64   : > { %804 = vmatpush.msra.mxu2 %v2615_v24  ;;  %767 = vmatpush.msra.mxu0 %v2569_v16 }
  0x65   : > { %787 = vmatpush.msra.mxu1 %v2574_v17  ;;  %827 = vmatpush.msra.mxu3 %v2586_v19  ;;  %v240_v19 = vld [vmem:[%s2472_s22 + $0x10] sm:$0xff] }
  0x66   : > { %805 = vmatpush.msra.mxu2 %v2639_v28  ;;  %768 = vmatpush.msra.mxu0 %v2597_v21 }
  0x67   : > { %788 = vmatpush.msra.mxu1 %v2602_v22  ;;  %828 = vmatpush.msra.mxu3 %v2610_v23 }
  0x68   : > { %806 = vmatpush.msra.mxu2 %v2663_v32  ;;  %769 = vmatpush.msra.mxu0 %v2621_v25 }
  0x69   : > { %789 = vmatpush.msra.mxu1 %v2626_v26  ;;  %829 = vmatpush.msra.mxu3 %v2634_v27 }
  0x6a   : > { %807 = vmatpush.msra.mxu2 %v2687_v36  ;;  %770 = vmatpush.msra.mxu0 %v2645_v29 }
  0x6b   : > { %790 = vmatpush.msra.mxu1 %v2650_v30  ;;  %830 = vmatpush.msra.mxu3 %v2658_v31 }
  0x6c   : > { %808 = vmatpush.msra.mxu2 %v2711_v40  ;;  %771 = vmatpush.msra.mxu0 %v2669_v33 }
  0x6d   : > { %791 = vmatpush.msra.mxu1 %v2674_v34  ;;  %831 = vmatpush.msra.mxu3 %v2682_v35 }
  0x6e   : > { %809 = vmatpush.msra.mxu2 %v2735_v44  ;;  %772 = vmatpush.msra.mxu0 %v2693_v37 }
  0x6f   : > { %792 = vmatpush.msra.mxu1 %v2698_v38  ;;  %832 = vmatpush.msra.mxu3 %v2706_v39 }
  0x70   : > { %810 = vmatpush.msra.mxu2 %v2759_v48  ;;  %773 = vmatpush.msra.mxu0 %v2717_v41 }
  0x71   : > { %793 = vmatpush.msra.mxu1 %v2722_v42  ;;  %833 = vmatpush.msra.mxu3 %v2730_v43  ;;  %v237_v43 = vld [vmem:[#allocation3] sm:$0xff] }
  0x72   : > { %811 = vmatpush.msra.mxu2 %v2783_v52  ;;  %774 = vmatpush.msra.mxu0 %v2741_v45 }
  0x73   : > { %794 = vmatpush.msra.mxu1 %v2746_v46  ;;  %834 = vmatpush.msra.mxu3 %v2754_v47 }
  0x74   : > { %812 = vmatpush.msra.mxu2 %v2813_v58  ;;  %775 = vmatpush.msra.mxu0 %v2765_v49 }
  0x75   : > { %795 = vmatpush.msra.mxu1 %v2770_v50  ;;  %835 = vmatpush.msra.mxu3 %v2778_v51 }
  0x76   : > { %813 = vmatpush.msra.mxu2 %v2844_v63  ;;  %776 = vmatpush.msra.mxu0 %v2789_v53 }
  0x77   : > { %796 = vmatpush.msra.mxu1 %v2794_v54  ;;  %836 = vmatpush.msra.mxu3 %v4265_v5 }
  0x78   : > { %814 = vmatpush.msra.mxu2 %v2855_v60  ;;  %777 = vmatpush.msra.mxu0 %v4266_v61 }
  0x79   : > { %797 = vmatpush.msra.mxu1 %v4267_v0  ;;  %837 = vmatpush.msra.mxu3 %v4268_v55 }
  0x7a   : > { %815 = vmatpush.msra.mxu2 %v2862_v59  ;;  %2270 = vset.pattern.permute.xlu1 %v4270_v1 }
  0x7b   : > { %2271 = vset.pattern.permute.xlu2 %v4270_v1 }
  0x7c   : > { %816 = vmatpush.msra.mxu2 %v2870_v57 }
  0x7e   : > { %817 = vmatpush.msra.mxu2 %v2880_v56  ;;  %v4271_v56 = vld [vmem:[#allocation10_spill] sm:$0xff] }
  0xa6   : > { %v458_v52 = vpop.permute.xlu0 %457 }
  0xa7   : > { %vm459_vm11 = vcmp.eq.s32.totalorder %v458_v52, 1 }
  0xb3   : > { %v323_v4 = vpop.f32.mrf.mxu0 }
  0xb4   : > { %v386_v6 = vadd.f32 %v323_v4, %v238_v2  ;;  %v343_v7 = vpop.f32.mrf.mxu1  ;;  %v2184_v2 = vld [vmem:[%s2472_s22 + $0x20] sm:$0xff] }
  0xb5   : > { %v387_v8 = vadd.f32 %v343_v7, %v239_v3  ;;  %v2185_v3 = vld [vmem:[%s2472_s22 + $0x28] sm:$0xff] }
  0xb6   : > { %v2181_v9 = vmul.f32 -1.442695, %v386_v6 }
  0xb7   : > { %v2182_v10 = vmul.f32 -1.442695, %v387_v8 }
  0xb8   : > { %2272 = vpow2.f32 %v2181_v9 }
  0xb9   : > { %2274 = vpow2.f32 %v2182_v10 }
  0xba   : > { %v383_v12 = vpop.f32.mrf.mxu3 }
  0xbb   : > { %v389_v13 = vadd.f32 %v383_v12, %v241_v11  ;;  %v2187_v11 = vld [vmem:[%s2472_s22 + $0x38] sm:$0xff] }
  0xbd   : > { %v2183_v14 = vmul.f32 -1.442695, %v389_v13 }
  0xbe   : > { %v2273_v15 = vpop.eup %2272 }
  0xbf   : > { %v2275_v16 = vpop.eup %2274  ;;  %v393_v17 = vadd.f32 1.0, %v2273_v15  ;;  %2276 = vpow2.f32 %v2183_v14 }
  0xc0   : > { %v412_v18 = vadd.f32 1.0, %v2275_v16 }
  0xc1   : > { %2278 = vrcp.f32 %v393_v17  ;;  %v405_v30 = vand.u32 2147483648, %v393_v17  ;;  %v403_v32 = vand.u32 2147483647, %v393_v17  ;;  %vm399_vm5 = vweird.f32 %v393_v17 }
  0xc2   : > { %2280 = vrcp.f32 %v412_v18  ;;  %v363_v20 = vpop.f32.mrf.mxu2  ;;  %v424_v33 = vand.u32 2147483648, %v412_v18  ;;  %v422_v35 = vand.u32 2147483647, %v412_v18  ;;  %vm418_vm7 = vweird.f32 %v412_v18 }
  0xc3   : > { %v388_v22 = vadd.f32 %v363_v20, %v240_v19  ;;  %v406_v40 = vor.u32 1.1754944e-38, %v405_v30  ;;  %vm404_vm8 = vcmp.eq.f32.partialorder %v403_v32, 8.507059e+37  ;;  %v910_v19 = vstv %s909_s5  ;;  %v2186_v20 = vld [vmem:[%s2472_s22 + $0x30] sm:$0xff] }
  0xc4   : > { %v425_v44 = vor.u32 1.1754944e-38, %v424_v33  ;;  %vm423_vm10 = vcmp.eq.f32.partialorder %v422_v35, 8.507059e+37 }
  0xc5   : > { %v2277_v21 = vpop.eup %2276 }
  0xc6   : > { %v432_v23 = vadd.f32 1.0, %v2277_v21 }
  0xc7   : > { %v2279_v24 = vpop.eup %2278 }
  0xc8   : > { %v2281_v25 = vpop.eup %2280  ;;  %v395_v26 = vmul.f32 %v2279_v24, %v393_v17  ;;  %2282 = vrcp.f32 %v432_v23  ;;  %vm400_vm3 = vweird.f32 %v2279_v24  ;;  %v444_v55 = vand.u32 2147483648, %v432_v23 }
  0xc9   : > { %v414_v27 = vmul.f32 %v2281_v25, %v412_v18  ;;  %2284 = vtanh.f32 %v388_v22  ;;  %vm419_vm4 = vweird.f32 %v2281_v25  ;;  %vm401_vm6 = vmor %vm399_vm5, %vm400_vm3  ;;  %vm438_vm13 = vweird.f32 %v432_v23  ;;  %v4272_v22 = vld [vmem:[#allocation5_spill] sm:$0xff] }
  0xca   : > { %v396_v28 = vsub.f32 1.0, %v395_v26  ;;  %vm420_vm9 = vmor %vm418_vm7, %vm419_vm4  ;;  %v442_v58 = vand.u32 2147483647, %v432_v23  ;;  %v445_v60 = vor.u32 1.1754944e-38, %v444_v55  ;;  %vm911_vm0 = vcmp.lt.s32.totalorder %v910_v19, %v4272_v22  ;;  %v3127_v19 = vld [vmem:[%s4203_s2 + $0x1b8] sm:$0xff] }
  0xcb   : > { %v415_v29 = vsub.f32 1.0, %v414_v27  ;;  %4279 = vst [vmem:[#allocation5_spill] sm:$0xff] %v3127_v19 }
  0xcc   : > { %v397_v31 = vmul.f32 %v2279_v24, %v396_v28  ;;  %vm443_vm15 = vcmp.eq.f32.partialorder %v442_v58, 8.507059e+37 }
  0xcd   : > { %v416_v34 = vmul.f32 %v2281_v25, %v415_v29 }
  0xce   : > { %v2283_v36 = vpop.eup %2282  ;;  %v398_v37 = vadd.f32 %v2279_v24, %v397_v31 }
  0xcf   : > { %v2285_v38 = vpop.eup %2284  ;;  %v434_v39 = vmul.f32 %v2283_v36, %v432_v23  ;;  %v417_v41 = vadd.f32 %v2281_v25, %v416_v34  ;;  %vm439_vm12 = vweird.f32 %v2283_v36 }
  0xd0   : > { %v402_v42 = vsel %vm401_vm6, %v2279_v24, %v398_v37  ;;  %vm440_vm14 = vmor %vm438_vm13, %vm439_vm12  ;;  %v912_v24 = vsel %vm911_vm0, 1, %v4270_v1 }
  0xd1   : > { %v435_v45 = vsub.f32 1.0, %v434_v39  ;;  %v407_v46 = vsel %vm404_vm8, %v406_v40, %v402_v42  ;;  %v421_v47 = vsel %vm420_vm9, %v2281_v25, %v417_v41  ;;  %v1139_v25 = vstv %s1138_s6  ;;  %914 = vperm.xlu1 %2270, %v912_v24   ;;  %v3158_v24 = vld [vmem:[%s4203_s2 + $0x160] sm:$0xff] }
  0xd2   : > { %v449_v48 = vmul.f32 %v2285_v38, %v407_v46  ;;  %v426_v49 = vsel %vm423_vm10, %v425_v44, %v421_v47  ;;  %vm1140_vm1 = vcmp.lt.s32.totalorder %v1139_v25, %v4272_v22  ;;  %v2055_v41 = vstv %s2054_s7  ;;  %v3163_v25 = vld [vmem:[%s4203_s2 + $0x168] sm:$0xff] }
  0xd3   : > { %v436_v50 = vmul.f32 %v2283_v36, %v435_v45  ;;  %v448_v51 = vmul.f32 %v426_v49, %v237_v43  ;;  %v1141_v35 = vsel %vm1140_vm1, 1, %v4270_v1  ;;  %vm2056_vm9 = vcmp.lt.s32.totalorder %v2055_v41, %v4272_v22  ;;  %v3144_v22 = vld [vmem:[%s4203_s2 + $0x190] sm:$0xff]  ;;  %v3249_v41 = vld [vmem:[%s4203_s2 + $0x118] sm:$0xff] }
  0xd5   : > { %v450_v53 = vadd.f32 %v449_v48, %v448_v51  ;;  %v437_v54 = vadd.f32 %v2283_v36, %v436_v50 }
  0xd7   : > { %2286 = vtanh.f32 %v450_v53  ;;  %v3019_v57 = vsel %vm459_vm11, %v450_v53, %v237_v43  ;;  %v441_v59 = vsel %vm440_vm14, %v2283_v36, %v437_v54 }
  0xd8   : > { %v446_v63 = vsel %vm443_vm15, %v445_v60, %v441_v59  ;;  %v2057_v59 = vsel %vm2056_vm9, 1, %v4270_v1  ;;  %v686_v60 = vpop.permute.xlu0 %685 }
  0xd9   : > { %1143 = vperm.xlu1 %2270, %v1141_v35   ;;  %v3223_v35 = vld [vmem:[%s4203_s2 + $0x138] sm:$0xff] }
  0xdd   : > { %v2287_v62 = vpop.eup %2286 }
  0xde   : > { %v452_v0 = vmul.f32 %v2287_v62, %v446_v63 }
  0xe0   : > { %v3023_v5 = vsel %vm459_vm11, %v452_v0, %v4271_v56  ;;  %v462_v61 = vsel %vm459_vm11, %v452_v0, 0.0  ;;  %vm687_vm11 = vcmp.eq.s32.totalorder %v686_v60, 1  ;;  %v2195_v60 = vld [vmem:[%s2472_s22 + $0x58] sm:$0xff] }
  0xe1   : > { %463 = vst [vmem:[%s2477_s25] sm:$0xff] %v462_v61  ;;  %549 = vmatmul.f32.vlgmr.msrb.gmra.mxu0 %v3023_v5  ;;  %569 = vmatmul.f32.vlgmr.msrb.gmra.mxu1 %v3023_v5 }
  0xe2   : > { %589 = vmatmul.f32.vlgmr.msrb.gmra.mxu2 %v3023_v5  ;;  %609 = vmatmul.f32.vlgmr.msrb.gmra.mxu3 %v3023_v5 }
  0xe3   : > { %2059 = vperm.xlu1 %2270, %v2057_v59   ;;  %v3309_v59 = vld [vmem:[%s4203_s2 + $0xa8] sm:$0xff] }
 0x15e   : > { %v550_v4 = vpop.f32.mrf.mxu0  ;;  %v570_v6 = vpop.f32.mrf.mxu1 }
 0x15f   : > { %v613_v7 = vadd.f32 %v2184_v2, %v550_v4  ;;  %v614_v8 = vadd.f32 %v2185_v3, %v570_v6 }
 0x161   : > { %v2188_v9 = vmul.f32 -1.442695, %v613_v7  ;;  %v2189_v10 = vmul.f32 -1.442695, %v614_v8 }
 0x163   : > { %2288 = vpow2.f32 %v2188_v9 }
 0x164   : > { %2290 = vpow2.f32 %v2189_v10  ;;  %v3072_v10 = vld [vmem:[%s4203_s2 + $0x1f0] sm:$0xff] }
 0x165   : > { %v610_v12 = vpop.f32.mrf.mxu3  ;;  %v590_v21 = vpop.f32.mrf.mxu2  ;;  %4275 = vst [vmem:[#allocation8_spill] sm:$0xff] %v3072_v10  ;;  %1031 = vmatpush.msrb.mxu2 %v3072_v10 }
 0x166   : > { %v616_v13 = vadd.f32 %v2187_v11, %v610_v12  ;;  %v615_v28 = vadd.f32 %v2186_v20, %v590_v21  ;;  %v3079_v11 = vld [vmem:[%s4203_s2 + $0x1f8] sm:$0xff]  ;;  %v3086_v12 = vld [vmem:[%s4203_s2 + $0x1c0] sm:$0xff]  ;;  %v3139_v21 = vld [vmem:[%s4203_s2 + $0x188] sm:$0xff] }
 0x167   : > { %4276 = vst [vmem:[#allocation9_spill] sm:$0xff] %v3079_v11  ;;  %1051 = vmatpush.msrb.mxu3 %v3079_v11  ;;  %v3134_v20 = vld [vmem:[%s4203_s2 + $0x180] sm:$0xff] }
 0x168   : > { %v2190_v14 = vmul.f32 -1.442695, %v616_v13  ;;  %v3091_v13 = vld [vmem:[%s4203_s2 + $0x1c8] sm:$0xff]  ;;  %4280 = vst [vmem:[#allocation11_spill] sm:$0xff] %v3134_v20 }
 0x169   : > { %v2289_v15 = vpop.eup %2288 }
 0x16a   : > { %v2291_v16 = vpop.eup %2290  ;;  %v620_v17 = vadd.f32 1.0, %v2289_v15  ;;  %2292 = vpow2.f32 %v2190_v14  ;;  %v3096_v14 = vld [vmem:[%s4203_s2 + $0x1d0] sm:$0xff]  ;;  %v3103_v15 = vld [vmem:[%s4203_s2 + $0x1d8] sm:$0xff] }
 0x16b   : > { %v639_v18 = vadd.f32 1.0, %v2291_v16  ;;  %1032 = vmatpush.msrb.mxu2 %v3096_v14  ;;  %1052 = vmatpush.msrb.mxu3 %v3103_v15  ;;  %v3110_v16 = vld [vmem:[%s4203_s2 + $0x1a0] sm:$0xff] }
 0x16c   : > { %2294 = vrcp.f32 %v620_v17  ;;  %v632_v34 = vand.u32 2147483648, %v620_v17  ;;  %v630_v38 = vand.u32 2147483647, %v620_v17  ;;  %vm626_vm4 = vweird.f32 %v620_v17 }
 0x16d   : > { %2296 = vrcp.f32 %v639_v18  ;;  %v651_v36 = vand.u32 2147483648, %v639_v18  ;;  %v649_v40 = vand.u32 2147483647, %v639_v18  ;;  %vm645_vm5 = vweird.f32 %v639_v18  ;;  %1053 = vmatpush.msrb.mxu3 %v3127_v19 }
 0x16e   : > { %v633_v44 = vor.u32 1.1754944e-38, %v632_v34  ;;  %vm631_vm8 = vcmp.eq.f32.partialorder %v630_v38, 8.507059e+37  ;;  %v3216_v34 = vld [vmem:[%s4203_s2 + $0x130] sm:$0xff] }
 0x16f   : > { %v652_v47 = vor.u32 1.1754944e-38, %v651_v36  ;;  %vm650_vm10 = vcmp.eq.f32.partialorder %v649_v40, 8.507059e+37  ;;  %v3230_v36 = vld [vmem:[%s4203_s2 + $0x100] sm:$0xff]  ;;  %v3240_v38 = vld [vmem:[%s4203_s2 + $0x110] sm:$0xff]  ;;  %v2193_v40 = vld [vmem:[%s2472_s22 + $0x48] sm:$0xff] }
 0x170   : > { %v2293_v23 = vpop.eup %2292 }
 0x171   : > { %v659_v26 = vadd.f32 1.0, %v2293_v23  ;;  %v3151_v23 = vld [vmem:[%s4203_s2 + $0x198] sm:$0xff] }
 0x172   : > { %v2295_v27 = vpop.eup %2294  ;;  %1054 = vmatpush.msrb.mxu3 %v3151_v23 }
 0x173   : > { %v2297_v29 = vpop.eup %2296  ;;  %v622_v30 = vmul.f32 %v2295_v27, %v620_v17  ;;  %2298 = vrcp.f32 %v659_v26  ;;  %vm627_vm2 = vweird.f32 %v2295_v27  ;;  %v671_v0 = vand.u32 2147483648, %v659_v26  ;;  %v3115_v17 = vld [vmem:[%s4203_s2 + $0x1a8] sm:$0xff] }
 0x174   : > { %v641_v31 = vmul.f32 %v2297_v29, %v639_v18  ;;  %2300 = vtanh.f32 %v615_v28  ;;  %vm646_vm3 = vweird.f32 %v2297_v29  ;;  %vm628_vm6 = vmor %vm626_vm4, %vm627_vm2  ;;  %vm665_vm13 = vweird.f32 %v659_v26  ;;  %4277 = vst [vmem:[#allocation4_spill] sm:$0xff] %v3115_v17  ;;  %v3120_v18 = vld [vmem:[%s4203_s2 + $0x1b0] sm:$0xff]  ;;  %v3182_v28 = vld [vmem:[%s4203_s2 + $0x140] sm:$0xff] }
 0x175   : > { %v623_v32 = vsub.f32 1.0, %v622_v30  ;;  %vm647_vm7 = vmor %vm645_vm5, %vm646_vm3  ;;  %v669_v61 = vand.u32 2147483647, %v659_v26  ;;  %v672_v3 = vor.u32 1.1754944e-38, %v671_v0  ;;  %4278 = vst [vmem:[#allocation10_spill] sm:$0xff] %v3120_v18  ;;  %1033 = vmatpush.msrb.mxu2 %v3120_v18  ;;  %v3192_v30 = vld [vmem:[%s4203_s2 + $0x150] sm:$0xff] }
 0x176   : > { %v642_v33 = vsub.f32 1.0, %v641_v31  ;;  %4284 = vst [vmem:[#allocation15_spill] sm:$0xff] %v3192_v30  ;;  %v3199_v31 = vld [vmem:[%s4203_s2 + $0x158] sm:$0xff]  ;;  %v3329_v0 = vld [vmem:[%s4203_s2 + $0x80] sm:$0xff] }
 0x177   : > { %v624_v37 = vmul.f32 %v2295_v27, %v623_v32  ;;  %vm670_vm15 = vcmp.eq.f32.partialorder %v669_v61, 8.507059e+37  ;;  %1034 = vmatpush.msrb.mxu2 %v3144_v22  ;;  %4285 = vst [vmem:[#allocation16_spill] sm:$0xff] %v3199_v31  ;;  %v3206_v32 = vld [vmem:[%s4203_s2 + $0x120] sm:$0xff]  ;;  %v3334_v61 = vld [vmem:[%s4203_s2 + $0x88] sm:$0xff] }
 0x178   : > { %v643_v39 = vmul.f32 %v2297_v29, %v642_v33  ;;  %v3211_v33 = vld [vmem:[%s4203_s2 + $0x128] sm:$0xff] }
 0x179   : > { %v2299_v42 = vpop.eup %2298  ;;  %v625_v43 = vadd.f32 %v2295_v27, %v624_v37  ;;  %v3235_v37 = vld [vmem:[%s4203_s2 + $0x108] sm:$0xff] }
 0x17a   : > { %v644_v45 = vadd.f32 %v2297_v29, %v643_v39  ;;  %v661_v46 = vmul.f32 %v2299_v42, %v659_v26  ;;  %v2301_v49 = vpop.eup %2300  ;;  %vm666_vm12 = vweird.f32 %v2299_v42  ;;  %v3168_v26 = vld [vmem:[%s4203_s2 + $0x170] sm:$0xff]  ;;  %v2192_v39 = vld [vmem:[%s2472_s22 + $0x40] sm:$0xff] }
 0x17b   : > { %v629_v48 = vsel %vm628_vm6, %v2295_v27, %v625_v43  ;;  %vm667_vm14 = vmor %vm665_vm13, %vm666_vm12  ;;  %4281 = vst [vmem:[#allocation12_spill] sm:$0xff] %v3168_v26  ;;  %v3175_v27 = vld [vmem:[%s4203_s2 + $0x178] sm:$0xff]  ;;  %1035 = vmatpush.msrb.mxu2 %v3168_v26  ;;  %v3261_v43 = vld [vmem:[%s4203_s2 + $0xe8] sm:$0xff] }
 0x17c   : > { %v634_v50 = vsel %vm631_vm8, %v633_v44, %v629_v48  ;;  %v648_v51 = vsel %vm647_vm7, %v2297_v29, %v644_v45  ;;  %v662_v52 = vsub.f32 1.0, %v661_v46  ;;  %4282 = vst [vmem:[#allocation13_spill] sm:$0xff] %v3175_v27  ;;  %1055 = vmatpush.msrb.mxu3 %v3175_v27  ;;  %v3187_v29 = vld [vmem:[%s4203_s2 + $0x148] sm:$0xff]  ;;  %v3266_v44 = vld [vmem:[%s4203_s2 + $0xf0] sm:$0xff] }
 0x17d   : > { %v653_v53 = vsel %vm650_vm10, %v652_v47, %v648_v51  ;;  %v676_v54 = vmul.f32 %v2301_v49, %v634_v50  ;;  %4283 = vst [vmem:[#allocation14_spill] sm:$0xff] %v3187_v29  ;;  %1036 = vmatpush.msrb.mxu2 %v3192_v30  ;;  %v3273_v47 = vld [vmem:[%s4203_s2 + $0xf8] sm:$0xff]  ;;  %v3280_v50 = vld [vmem:[%s4203_s2 + $0xc0] sm:$0xff]  ;;  %v3285_v51 = vld [vmem:[%s4203_s2 + $0xc8] sm:$0xff] }
 0x17e   : > { %v675_v55 = vmul.f32 %v653_v53, %v3019_v57  ;;  %v663_v58 = vmul.f32 %v2299_v42, %v662_v52  ;;  %1056 = vmatpush.msrb.mxu3 %v3199_v31  ;;  %v3290_v52 = vld [vmem:[%s4203_s2 + $0xd0] sm:$0xff]  ;;  %v3297_v53 = vld [vmem:[%s4203_s2 + $0xd8] sm:$0xff] }
 0x17f   : > { %1037 = vmatpush.msrb.mxu2 %v3216_v34 }
 0x180   : > { %v677_v62 = vadd.f32 %v676_v54, %v675_v55  ;;  %v664_v63 = vadd.f32 %v2299_v42, %v663_v58  ;;  %1057 = vmatpush.msrb.mxu3 %v3223_v35  ;;  %v3304_v58 = vld [vmem:[%s4203_s2 + $0xa0] sm:$0xff] }
 0x181   : > { %1038 = vmatpush.msrb.mxu2 %v3240_v38 }
 0x182   : > { %2302 = vtanh.f32 %v677_v62  ;;  %v3047_v56 = vsel %vm687_vm11, %v677_v62, %v3019_v57  ;;  %v668_v2 = vsel %vm667_vm14, %v2299_v42, %v664_v63  ;;  %v3062_v57 = vld [vmem:[%s4203_s2 + $0x1e0] sm:$0xff]  ;;  %1058 = vmatpush.msrb.mxu3 %v3249_v41  ;;  %v3317_v62 = vld [vmem:[%s4203_s2 + $0xb0] sm:$0xff]  ;;  %v3322_v63 = vld [vmem:[%s4203_s2 + $0xb8] sm:$0xff] }
 0x183   : > { %v673_v6 = vsel %vm670_vm15, %v672_v3, %v668_v2  ;;  %4274 = vst [vmem:[#allocation7_spill] sm:$0xff] %v3062_v57  ;;  %991 = vmatpush.msrb.mxu0 %v3062_v57  ;;  %v3256_v42 = vld [vmem:[%s4203_s2 + $0xe0] sm:$0xff]  ;;  %1039 = vmatpush.msrb.mxu2 %v3266_v44  ;;  %v3339_v2 = vld [vmem:[%s4203_s2 + $0x90] sm:$0xff]  ;;  %v3346_v3 = vld [vmem:[%s4203_s2 + $0x98] sm:$0xff] }
 0x184   : > { %1059 = vmatpush.msrb.mxu3 %v3273_v47 }
 0x185   : > { %992 = vmatpush.msrb.mxu0 %v3086_v12  ;;  %1040 = vmatpush.msrb.mxu2 %v3290_v52 }
 0x186   : > { %1060 = vmatpush.msrb.mxu3 %v3297_v53 }
 0x187   : > { %993 = vmatpush.msrb.mxu0 %v3110_v16  ;;  %1041 = vmatpush.msrb.mxu2 %v3317_v62 }
 0x188   : > { %v2303_v4 = vpop.eup %2302  ;;  %1061 = vmatpush.msrb.mxu3 %v3322_v63 }
 0x189   : > { %v679_v7 = vmul.f32 %v2303_v4, %v673_v6  ;;  %994 = vmatpush.msrb.mxu0 %v3134_v20  ;;  %1042 = vmatpush.msrb.mxu2 %v3339_v2  ;;  %v3353_v6 = vld [vmem:[%s4203_s2 + $0x60] sm:$0xff] }
 0x18a   : > { %1062 = vmatpush.msrb.mxu3 %v3346_v3 }
 0x18b   : > { %v3051_v8 = vsel %vm687_vm11, %v679_v7, %v3023_v5  ;;  %v690_v9 = vsel %vm687_vm11, %v679_v7, 0.0  ;;  %v3067_v5 = vld [vmem:[%s4203_s2 + $0x1e8] sm:$0xff]  ;;  %995 = vmatpush.msrb.mxu0 %v3158_v24 }
 0x18c   : > { %4273 = vst [vmem:[#allocation6_spill] sm:$0xff] %v3051_v8  ;;  %778 = vmatmul.f32.vlgmr.msra.gmra.mxu0 %v3051_v8  ;;  %798 = vmatmul.f32.vlgmr.msra.gmra.mxu1 %v3051_v8  ;;  %v3358_v7 = vld [vmem:[%s4203_s2 + $0x68] sm:$0xff] }
 0x18d   : > { %2191 = vst [vmem:[%s2477_s25 + $0x8] sm:$0xff] %v690_v9  ;;  %818 = vmatmul.f32.vlgmr.msra.gmra.mxu2 %v3051_v8  ;;  %838 = vmatmul.f32.vlgmr.msra.gmra.mxu3 %v3051_v8  ;;  %v3363_v9 = vld [vmem:[%s4203_s2 + $0x70] sm:$0xff] }
 0x18e   : > { %1011 = vmatpush.msrb.mxu1 %v3067_v5  ;;  %996 = vmatpush.msrb.mxu0 %v3182_v28 }
 0x18f   : > { %1043 = vmatpush.msrb.mxu2 %v3363_v9 }
 0x190   : > { %1012 = vmatpush.msrb.mxu1 %v3091_v13  ;;  %997 = vmatpush.msrb.mxu0 %v3206_v32 }
 0x192   : > { %1013 = vmatpush.msrb.mxu1 %v3115_v17  ;;  %998 = vmatpush.msrb.mxu0 %v3230_v36 }
 0x194   : > { %1014 = vmatpush.msrb.mxu1 %v3139_v21  ;;  %999 = vmatpush.msrb.mxu0 %v3256_v42 }
 0x196   : > { %1015 = vmatpush.msrb.mxu1 %v3163_v25  ;;  %1000 = vmatpush.msrb.mxu0 %v3280_v50 }
 0x198   : > { %1016 = vmatpush.msrb.mxu1 %v3187_v29  ;;  %1001 = vmatpush.msrb.mxu0 %v3304_v58 }
 0x19a   : > { %1017 = vmatpush.msrb.mxu1 %v3211_v33  ;;  %1002 = vmatpush.msrb.mxu0 %v3329_v0 }
 0x19c   : > { %1018 = vmatpush.msrb.mxu1 %v3235_v37  ;;  %1003 = vmatpush.msrb.mxu0 %v3353_v6 }
 0x19e   : > { %1019 = vmatpush.msrb.mxu1 %v3261_v43 }
 0x1a0   : > { %1020 = vmatpush.msrb.mxu1 %v3285_v51 }
 0x1a2   : > { %1021 = vmatpush.msrb.mxu1 %v3309_v59 }
 0x1a4   : > { %1022 = vmatpush.msrb.mxu1 %v3334_v61 }
 0x1a6   : > { %1023 = vmatpush.msrb.mxu1 %v3358_v7 }
 0x209   : > { %v779_v45 = vpop.f32.mrf.mxu0  ;;  %v799_v46 = vpop.f32.mrf.mxu1 }
 0x20a   : > { %v842_v48 = vadd.f32 %v2192_v39, %v779_v45  ;;  %v843_v49 = vadd.f32 %v2193_v40, %v799_v46  ;;  %v3370_v40 = vld [vmem:[%s4203_s2 + $0x78] sm:$0xff]  ;;  %v3377_v45 = vld [vmem:[%s4203_s2 + $0x40] sm:$0xff]  ;;  %v3382_v46 = vld [vmem:[%s4203_s2 + $0x48] sm:$0xff] }
 0x20b   : > { %1063 = vmatpush.msrb.mxu3 %v3370_v40  ;;  %1004 = vmatpush.msrb.mxu0 %v3377_v45 }
 0x20c   : > { %v2196_v54 = vmul.f32 -1.442695, %v842_v48  ;;  %v2197_v55 = vmul.f32 -1.442695, %v843_v49  ;;  %v3387_v48 = vld [vmem:[%s4203_s2 + $0x50] sm:$0xff]  ;;  %1024 = vmatpush.msrb.mxu1 %v3382_v46 }
 0x20d   : > { %4286 = vst [vmem:[#allocation17_spill] sm:$0xff] %v3387_v48  ;;  %1044 = vmatpush.msrb.mxu2 %v3387_v48 }
 0x20e   : > { %2304 = vpow2.f32 %v2196_v54  ;;  %v3394_v54 = vld [vmem:[%s4203_s2 + $0x58] sm:$0xff] }
 0x20f   : > { %2306 = vpow2.f32 %v2197_v55  ;;  %4287 = vst [vmem:[#allocation18_spill] sm:$0xff] %v3394_v54  ;;  %1064 = vmatpush.msrb.mxu3 %v3394_v54  ;;  %v3420_v54 = vld [vmem:[%s4203_s2 + $0x38] sm:$0xff] }
 0x210   : > { %v839_v4 = vpop.f32.mrf.mxu3  ;;  %4290 = vst [vmem:[#allocation21_spill] sm:$0xff] %v3420_v54 }
 0x211   : > { %v845_v39 = vadd.f32 %v2195_v60, %v839_v4  ;;  %v3401_v60 = vld [vmem:[%s4203_s2 + $0x20] sm:$0xff]  ;;  %v3406_v4 = vld [vmem:[%s4203_s2 + $0x28] sm:$0xff]  ;;  %1065 = vmatpush.msrb.mxu3 %v3420_v54  ;;  %v2194_v54 = vld [vmem:[%s2472_s22 + $0x50] sm:$0xff] }
 0x212   : > { %4288 = vst [vmem:[#allocation19_spill] sm:$0xff] %v3406_v4  ;;  %1005 = vmatpush.msrb.mxu0 %v3401_v60  ;;  %1025 = vmatpush.msrb.mxu1 %v3406_v4  ;;  %v3439_v4 = vld [vmem:[%s4203_s2 + $0x10] sm:$0xff] }
 0x213   : > { %v2198_v49 = vmul.f32 -1.442695, %v845_v39  ;;  %v3411_v39 = vld [vmem:[%s4203_s2 + $0x30] sm:$0xff] }
 0x214   : > { %v2305_v55 = vpop.eup %2304  ;;  %4289 = vst [vmem:[#allocation20_spill] sm:$0xff] %v3411_v39  ;;  %1045 = vmatpush.msrb.mxu2 %v3411_v39  ;;  %v819_v39 = vpop.f32.mrf.mxu2 }
 0x215   : > { %v2307_v1 = vpop.eup %2306  ;;  %v3413_v8 = vadd.f32 1.0, %v2305_v55  ;;  %2308 = vpow2.f32 %v2198_v49  ;;  %v3429_v49 = vld [vmem:[%s4203_s2] sm:$0xff]  ;;  %v3434_v55 = vld [vmem:[%s4203_s2 + $0x8] sm:$0xff] }
 0x216   : > { %v3422_v48 = vadd.f32 1.0, %v2307_v1  ;;  %4291 = vst [vmem:[#allocation22_spill] sm:$0xff] %v3429_v49  ;;  %1006 = vmatpush.msrb.mxu0 %v3429_v49  ;;  %1026 = vmatpush.msrb.mxu1 %v3434_v55  ;;  %v3447_v1 = vld [vmem:[%s4203_s2 + $0x18] sm:$0xff] }
 0x217   : > { %4292 = vst [vmem:[#allocation23_spill] sm:$0xff] %v3434_v55  ;;  %2310 = vrcp.f32 %v3413_v8  ;;  %1046 = vmatpush.msrb.mxu2 %v3439_v4  ;;  %1066 = vmatpush.msrb.mxu3 %v3447_v1  ;;  %vm855_vm2 = vweird.f32 %v3413_v8 }
 0x218   : > { %4293 = vst [vmem:[#allocation24_spill] sm:$0xff] %v3447_v1  ;;  %2312 = vrcp.f32 %v3422_v48  ;;  %1220 = vmatpush.msra.mxu0 %v3062_v57  ;;  %1240 = vmatpush.msra.mxu1 %v3067_v5  ;;  %v844_v1 = vadd.f32 %v2194_v54, %v819_v39  ;;  %vm874_vm4 = vweird.f32 %v3422_v48 }
 0x219   : > { %1260 = vmatpush.msra.mxu2 %v3072_v10  ;;  %1280 = vmatpush.msra.mxu3 %v3079_v11 }
 0x21a   : > { %1221 = vmatpush.msra.mxu0 %v3086_v12  ;;  %1241 = vmatpush.msra.mxu1 %v3091_v13 }
 0x21b   : > { %v2309_v55 = vpop.eup %2308  ;;  %1261 = vmatpush.msra.mxu2 %v3096_v14  ;;  %1281 = vmatpush.msra.mxu3 %v3103_v15 }
 0x21c   : > { %v3459_v49 = vadd.f32 1.0, %v2309_v55  ;;  %1222 = vmatpush.msra.mxu0 %v3110_v16  ;;  %1242 = vmatpush.msra.mxu1 %v3115_v17  ;;  %v861_v17 = vand.u32 2147483648, %v3413_v8 }
 0x21d   : > { %v2311_v57 = vpop.eup %2310  ;;  %1262 = vmatpush.msra.mxu2 %v3120_v18  ;;  %1282 = vmatpush.msra.mxu3 %v3127_v19  ;;  %v859_v18 = vand.u32 2147483647, %v3413_v8 }
 0x21e   : > { %v2313_v10 = vpop.eup %2312  ;;  %v851_v11 = vmul.f32 %v2311_v57, %v3413_v8  ;;  %2314 = vrcp.f32 %v3459_v49  ;;  %1223 = vmatpush.msra.mxu0 %v3134_v20  ;;  %1243 = vmatpush.msra.mxu1 %v3139_v21  ;;  %vm856_vm0 = vweird.f32 %v2311_v57  ;;  %v880_v20 = vand.u32 2147483648, %v3422_v48 }
 0x21f   : > { %v870_v55 = vmul.f32 %v2313_v10, %v3422_v48  ;;  %1263 = vmatpush.msra.mxu2 %v3144_v22  ;;  %1283 = vmatpush.msra.mxu3 %v3151_v23  ;;  %2316 = vtanh.f32 %v844_v1  ;;  %vm875_vm1 = vweird.f32 %v2313_v10  ;;  %vm857_vm3 = vmor %vm855_vm2, %vm856_vm0  ;;  %vm860_vm5 = vcmp.eq.f32.partialorder %v859_v18, 8.507059e+37 }
 0x220   : > { %v852_v54 = vsub.f32 1.0, %v851_v11  ;;  %1224 = vmatpush.msra.mxu0 %v3158_v24  ;;  %1244 = vmatpush.msra.mxu1 %v3163_v25  ;;  %vm876_vm6 = vmor %vm874_vm4, %vm875_vm1  ;;  %v881_v8 = vor.u32 1.1754944e-38, %v880_v20  ;;  %vm894_vm10 = vweird.f32 %v3459_v49 }
 0x221   : > { %v871_v39 = vsub.f32 1.0, %v870_v55  ;;  %1264 = vmatpush.msra.mxu2 %v3168_v26  ;;  %1284 = vmatpush.msra.mxu3 %v3175_v27  ;;  %v878_v55 = vand.u32 2147483647, %v3422_v48  ;;  %v862_v27 = vor.u32 1.1754944e-38, %v861_v17 }
 0x222   : > { %v853_v19 = vmul.f32 %v2311_v57, %v852_v54  ;;  %1225 = vmatpush.msra.mxu0 %v3182_v28  ;;  %1245 = vmatpush.msra.mxu1 %v3187_v29 }
 0x223   : > { %v872_v11 = vmul.f32 %v2313_v10, %v871_v39  ;;  %1265 = vmatpush.msra.mxu2 %v3192_v30  ;;  %1285 = vmatpush.msra.mxu3 %v3199_v31  ;;  %vm879_vm7 = vcmp.eq.f32.partialorder %v878_v55, 8.507059e+37 }
 0x224   : > { %v3484_v1 = vpop.eup %2314  ;;  %v854_v54 = vadd.f32 %v2311_v57, %v853_v19  ;;  %1226 = vmatpush.msra.mxu0 %v3206_v32  ;;  %1246 = vmatpush.msra.mxu1 %v3211_v33 }
 0x225   : > { %v890_v39 = vmul.f32 %v3484_v1, %v3459_v49  ;;  %v873_v26 = vadd.f32 %v2313_v10, %v872_v11  ;;  %1266 = vmatpush.msra.mxu2 %v3216_v34  ;;  %1286 = vmatpush.msra.mxu3 %v3223_v35  ;;  %v2317_v17 = vpop.eup %2316  ;;  %vm895_vm9 = vweird.f32 %v3484_v1 }
 0x226   : > { %v858_v19 = vsel %vm857_vm3, %v2311_v57, %v854_v54  ;;  %1227 = vmatpush.msra.mxu0 %v3230_v36  ;;  %1247 = vmatpush.msra.mxu1 %v3235_v37  ;;  %v915_v57 = vpop.permute.xlu1 %914  ;;  %vm896_vm11 = vmor %vm894_vm10, %vm895_vm9  ;;  %v4294_v54 = vld [vmem:[#allocation17_spill] sm:$0xff] }
 0x227   : > { %v863_v31 = vsel %vm860_vm5, %v862_v27, %v858_v19  ;;  %v891_v30 = vsub.f32 1.0, %v890_v39  ;;  %v877_v29 = vsel %vm876_vm6, %v2313_v10, %v873_v26  ;;  %1267 = vmatpush.msra.mxu2 %v3240_v38  ;;  %1287 = vmatpush.msra.mxu3 %v3249_v41  ;;  %vm916_vm8 = vcmp.eq.s32.totalorder %v915_v57, 1  ;;  %v4295_v39 = vld [vmem:[#allocation18_spill] sm:$0xff]  ;;  %v4296_v19 = vld [vmem:[#allocation19_spill] sm:$0xff]  ;;  %v4302_v57 = vld [vmem:[#allocation24_spill] sm:$0xff] }
 0x228   : > { %v905_v48 = vmul.f32 %v2317_v17, %v863_v31  ;;  %v882_v11 = vsel %vm879_vm7, %v881_v8, %v877_v29  ;;  %1228 = vmatpush.msra.mxu0 %v3256_v42  ;;  %1248 = vmatpush.msra.mxu1 %v3261_v43  ;;  %v900_v27 = vand.u32 2147483648, %v3459_v49  ;;  %v4297_v8 = vld [vmem:[#allocation6_spill] sm:$0xff] }
 0x229   : > { %v892_v18 = vmul.f32 %v3484_v1, %v891_v30  ;;  %v904_v20 = vmul.f32 %v882_v11, %v3047_v56  ;;  %1268 = vmatpush.msra.mxu2 %v3266_v44  ;;  %1288 = vmatpush.msra.mxu3 %v3273_v47  ;;  %v898_v30 = vand.u32 2147483647, %v3459_v49  ;;  %v4298_v11 = vld [vmem:[#allocation20_spill] sm:$0xff] }
 0x22a   : > { %1229 = vmatpush.msra.mxu0 %v3280_v50  ;;  %1249 = vmatpush.msra.mxu1 %v3285_v51  ;;  %v901_v31 = vor.u32 1.1754944e-38, %v900_v27  ;;  %v4304_v27 = vld [vmem:[#allocation8_spill] sm:$0xff] }
 0x22b   : > { %v906_v10 = vadd.f32 %v905_v48, %v904_v20  ;;  %v893_v26 = vadd.f32 %v3484_v1, %v892_v18  ;;  %1269 = vmatpush.msra.mxu2 %v3290_v52  ;;  %1289 = vmatpush.msra.mxu3 %v3297_v53  ;;  %vm899_vm12 = vcmp.eq.f32.partialorder %v898_v30, 8.507059e+37  ;;  %v4299_v18 = vld [vmem:[#allocation21_spill] sm:$0xff]  ;;  %v4300_v20 = vld [vmem:[#allocation22_spill] sm:$0xff] }
 0x22c   : > { %1230 = vmatpush.msra.mxu0 %v3304_v58  ;;  %1250 = vmatpush.msra.mxu1 %v3309_v59  ;;  %v4305_v30 = vld [vmem:[#allocation9_spill] sm:$0xff] }
 0x22d   : > { %2318 = vtanh.f32 %v906_v10  ;;  %v3517_v29 = vsel %vm916_vm8, %v906_v10, %v3047_v56  ;;  %1270 = vmatpush.msra.mxu2 %v3317_v62  ;;  %1290 = vmatpush.msra.mxu3 %v3322_v63  ;;  %v897_v56 = vsel %vm896_vm11, %v3484_v1, %v893_v26  ;;  %v4301_v10 = vld [vmem:[#allocation23_spill] sm:$0xff] }
 0x22e   : > { %1231 = vmatpush.msra.mxu0 %v3329_v0  ;;  %1251 = vmatpush.msra.mxu1 %v3334_v61  ;;  %v902_v55 = vsel %vm899_vm12, %v901_v31, %v897_v56  ;;  %v4303_v26 = vld [vmem:[#allocation7_spill] sm:$0xff]  ;;  %v4306_v56 = vld [vmem:[#allocation4_spill] sm:$0xff]  ;;  %v4307_v31 = vld [vmem:[#allocation10_spill] sm:$0xff] }
 0x22f   : > { %1271 = vmatpush.msra.mxu2 %v3339_v2  ;;  %1291 = vmatpush.msra.mxu3 %v3346_v3 }
 0x230   : > { %1232 = vmatpush.msra.mxu0 %v3353_v6  ;;  %1252 = vmatpush.msra.mxu1 %v3358_v7 }
 0x231   : > { %1272 = vmatpush.msra.mxu2 %v3363_v9  ;;  %1292 = vmatpush.msra.mxu3 %v3370_v40 }
 0x232   : > { %1233 = vmatpush.msra.mxu0 %v3377_v45  ;;  %1253 = vmatpush.msra.mxu1 %v3382_v46 }
 0x233   : > { %v2319_v49 = vpop.eup %2318  ;;  %1273 = vmatpush.msra.mxu2 %v4294_v54  ;;  %1293 = vmatpush.msra.mxu3 %v4295_v39 }
 0x234   : > { %v908_v1 = vmul.f32 %v2319_v49, %v902_v55  ;;  %1234 = vmatpush.msra.mxu0 %v3401_v60  ;;  %1254 = vmatpush.msra.mxu1 %v4296_v19  ;;  %v4308_v49 = vld [vmem:[#allocation5_spill] sm:$0xff] }
 0x235   : > { %1274 = vmatpush.msra.mxu2 %v4298_v11  ;;  %1294 = vmatpush.msra.mxu3 %v4299_v18 }
 0x236   : > { %v3542_v17 = vsel %vm916_vm8, %v908_v1, %v4297_v8  ;;  %v919_v48 = vsel %vm916_vm8, %v908_v1, 0.0  ;;  %1235 = vmatpush.msra.mxu0 %v4300_v20  ;;  %1255 = vmatpush.msra.mxu1 %v4301_v10 }
 0x237   : > { %2199 = vst [vmem:[%s2477_s25 + $0x10] sm:$0xff] %v919_v48  ;;  %1007 = vmatmul.f32.vlgmr.msrb.gmra.mxu0 %v3542_v17  ;;  %1027 = vmatmul.f32.vlgmr.msrb.gmra.mxu1 %v3542_v17 }
 0x238   : > { %1047 = vmatmul.f32.vlgmr.msrb.gmra.mxu2 %v3542_v17  ;;  %1067 = vmatmul.f32.vlgmr.msrb.gmra.mxu3 %v3542_v17 }
 0x239   : > { %1275 = vmatpush.msra.mxu2 %v3439_v4  ;;  %1295 = vmatpush.msra.mxu3 %v4302_v57 }
 0x23a   : > { %1449 = vmatpush.msrb.mxu0 %v4303_v26  ;;  %1469 = vmatpush.msrb.mxu1 %v3067_v5  ;;  %v4309_v5 = vld [vmem:[#allocation11_spill] sm:$0xff] }
 0x23b   : > { %1489 = vmatpush.msrb.mxu2 %v4304_v27  ;;  %1509 = vmatpush.msrb.mxu3 %v4305_v30 }
 0x23c   : > { %1450 = vmatpush.msrb.mxu0 %v3086_v12  ;;  %1470 = vmatpush.msrb.mxu1 %v3091_v13  ;;  %v4310_v12 = vld [vmem:[#allocation12_spill] sm:$0xff]  ;;  %v4311_v13 = vld [vmem:[#allocation13_spill] sm:$0xff] }
 0x23d   : > { %1490 = vmatpush.msrb.mxu2 %v3096_v14  ;;  %1510 = vmatpush.msrb.mxu3 %v3103_v15  ;;  %v4312_v14 = vld [vmem:[#allocation14_spill] sm:$0xff]  ;;  %v4313_v15 = vld [vmem:[#allocation15_spill] sm:$0xff] }
 0x23e   : > { %1451 = vmatpush.msrb.mxu0 %v3110_v16  ;;  %1471 = vmatpush.msrb.mxu1 %v4306_v56  ;;  %v4314_v16 = vld [vmem:[#allocation16_spill] sm:$0xff] }
 0x23f   : > { %1491 = vmatpush.msrb.mxu2 %v4307_v31  ;;  %1511 = vmatpush.msrb.mxu3 %v4308_v49  ;;  %v1144_v31 = vpop.permute.xlu1 %1143 }
 0x240   : > { %1452 = vmatpush.msrb.mxu0 %v4309_v5  ;;  %1472 = vmatpush.msrb.mxu1 %v3139_v21  ;;  %v2200_v21 = vld [vmem:[%s2472_s22 + $0x60] sm:$0xff]  ;;  %vm1145_vm7 = vcmp.eq.s32.totalorder %v1144_v31, 1 }
 0x241   : > { %1492 = vmatpush.msrb.mxu2 %v3144_v22  ;;  %1512 = vmatpush.msrb.mxu3 %v3151_v23  ;;  %v2201_v22 = vld [vmem:[%s2472_s22 + $0x68] sm:$0xff] }
 0x242   : > { %1453 = vmatpush.msrb.mxu0 %v3158_v24  ;;  %1473 = vmatpush.msrb.mxu1 %v3163_v25 }
 0x243   : > { %1493 = vmatpush.msrb.mxu2 %v4310_v12  ;;  %1513 = vmatpush.msrb.mxu3 %v4311_v13 }
 0x244   : > { %1454 = vmatpush.msrb.mxu0 %v3182_v28  ;;  %1474 = vmatpush.msrb.mxu1 %v4312_v14 }
 0x245   : > { %1494 = vmatpush.msrb.mxu2 %v4313_v15  ;;  %1514 = vmatpush.msrb.mxu3 %v4314_v16 }
 0x246   : > { %1455 = vmatpush.msrb.mxu0 %v3206_v32  ;;  %1475 = vmatpush.msrb.mxu1 %v3211_v33 }
 0x247   : > { %1495 = vmatpush.msrb.mxu2 %v3216_v34  ;;  %1515 = vmatpush.msrb.mxu3 %v3223_v35  ;;  %v2203_v34 = vld [vmem:[%s2472_s22 + $0x78] sm:$0xff] }
 0x248   : > { %1456 = vmatpush.msrb.mxu0 %v3230_v36  ;;  %1476 = vmatpush.msrb.mxu1 %v3235_v37 }
 0x249   : > { %1496 = vmatpush.msrb.mxu2 %v3240_v38  ;;  %1516 = vmatpush.msrb.mxu3 %v3249_v41 }
 0x24a   : > { %1457 = vmatpush.msrb.mxu0 %v3256_v42  ;;  %1477 = vmatpush.msrb.mxu1 %v3261_v43 }
 0x24b   : > { %1497 = vmatpush.msrb.mxu2 %v3266_v44  ;;  %1517 = vmatpush.msrb.mxu3 %v3273_v47  ;;  %v1368_v44 = vstv %s1367_s10  ;;  %v2202_v47 = vld [vmem:[%s2472_s22 + $0x70] sm:$0xff] }
 0x24c   : > { %1458 = vmatpush.msrb.mxu0 %v3280_v50  ;;  %1478 = vmatpush.msrb.mxu1 %v3285_v51  ;;  %v2400_v51 = vld [vmem:[%s4201_s0] sm:$0xff] }
 0x24d   : > { %1498 = vmatpush.msrb.mxu2 %v3290_v52  ;;  %1518 = vmatpush.msrb.mxu3 %v3297_v53  ;;  %vm1369_vm13 = vcmp.lt.s32.totalorder %v1368_v44, %v2400_v51  ;;  %v4315_v53 = vmov 0  }
 0x24e   : > { %1459 = vmatpush.msrb.mxu0 %v3304_v58  ;;  %1479 = vmatpush.msrb.mxu1 %v3309_v59  ;;  %v1370_v58 = vsel %vm1369_vm13, 1, %v4315_v53  ;;  %v1597_v59 = vstv %s1596_s11 }
 0x24f   : > { %1499 = vmatpush.msrb.mxu2 %v3317_v62  ;;  %1519 = vmatpush.msrb.mxu3 %v3322_v63  ;;  %vm1598_vm14 = vcmp.lt.s32.totalorder %v1597_v59, %v2400_v51  ;;  %v2210_v51 = vld [vmem:[%s2472_s22 + $0x90] sm:$0xff] }
 0x250   : > { %1460 = vmatpush.msrb.mxu0 %v3329_v0  ;;  %1480 = vmatpush.msrb.mxu1 %v3334_v61 }
 0x251   : > { %1500 = vmatpush.msrb.mxu2 %v3339_v2  ;;  %1520 = vmatpush.msrb.mxu3 %v3346_v3 }
 0x252   : > { %1461 = vmatpush.msrb.mxu0 %v3353_v6  ;;  %1481 = vmatpush.msrb.mxu1 %v3358_v7 }
 0x253   : > { %1501 = vmatpush.msrb.mxu2 %v3363_v9  ;;  %1521 = vmatpush.msrb.mxu3 %v3370_v40  ;;  %v1599_v40 = vsel %vm1598_vm14, 1, %v4315_v53 }
 0x254   : > { %1462 = vmatpush.msrb.mxu0 %v3377_v45  ;;  %1482 = vmatpush.msrb.mxu1 %v3382_v46 }
 0x255   : > { %1502 = vmatpush.msrb.mxu2 %v4294_v54  ;;  %1522 = vmatpush.msrb.mxu3 %v4295_v39 }
 0x256   : > { %1463 = vmatpush.msrb.mxu0 %v3401_v60  ;;  %1483 = vmatpush.msrb.mxu1 %v4296_v19 }
 0x257   : > { %1503 = vmatpush.msrb.mxu2 %v4298_v11  ;;  %1523 = vmatpush.msrb.mxu3 %v4299_v18 }
 0x258   : > { %1464 = vmatpush.msrb.mxu0 %v4300_v20  ;;  %1484 = vmatpush.msrb.mxu1 %v4301_v10 }
 0x259   : > { %1504 = vmatpush.msrb.mxu2 %v3439_v4  ;;  %1524 = vmatpush.msrb.mxu3 %v4302_v57 }
 0x25a   : > { %1372 = vperm.xlu2 %2271, %v1370_v58  }
 0x262   : > { %1601 = vperm.xlu2 %2271, %v1599_v40  }
 0x2b4   : > { %v1008_v23 = vpop.f32.mrf.mxu0  ;;  %v1028_v24 = vpop.f32.mrf.mxu1 }
 0x2b5   : > { %v1071_v25 = vadd.f32 %v2200_v21, %v1008_v23  ;;  %v1072_v28 = vadd.f32 %v2201_v22, %v1028_v24 }
 0x2b7   : > { %v2204_v32 = vmul.f32 -1.442695, %v1071_v25  ;;  %v2205_v33 = vmul.f32 -1.442695, %v1072_v28  ;;  %v2209_v28 = vld [vmem:[%s2472_s22 + $0x88] sm:$0xff] }
 0x2b9   : > { %2320 = vpow2.f32 %v2204_v32 }
 0x2ba   : > { %2322 = vpow2.f32 %v2205_v33 }
 0x2bb   : > { %v1068_v35 = vpop.f32.mrf.mxu3  ;;  %v1048_v50 = vpop.f32.mrf.mxu2 }
 0x2bc   : > { %v1074_v36 = vadd.f32 %v2203_v34, %v1068_v35  ;;  %v1073_v0 = vadd.f32 %v2202_v47, %v1048_v50 }
 0x2be   : > { %v2206_v37 = vmul.f32 -1.442695, %v1074_v36 }
 0x2bf   : > { %v2321_v38 = vpop.eup %2320 }
 0x2c0   : > { %v2323_v41 = vpop.eup %2322  ;;  %v1078_v42 = vadd.f32 1.0, %v2321_v38  ;;  %2324 = vpow2.f32 %v2206_v37  ;;  %v2211_v37 = vld [vmem:[%s2472_s22 + $0x98] sm:$0xff] }
 0x2c1   : > { %v1097_v43 = vadd.f32 1.0, %v2323_v41 }
 0x2c2   : > { %2326 = vrcp.f32 %v1078_v42  ;;  %v1090_v9 = vand.u32 2147483648, %v1078_v42  ;;  %v1088_v60 = vand.u32 2147483647, %v1078_v42  ;;  %vm1084_vm1 = vweird.f32 %v1078_v42 }
 0x2c3   : > { %2328 = vrcp.f32 %v1097_v43  ;;  %v1109_v45 = vand.u32 2147483648, %v1097_v43  ;;  %v1107_v55 = vand.u32 2147483647, %v1097_v43  ;;  %vm1103_vm2 = vweird.f32 %v1097_v43 }
 0x2c4   : > { %v1091_v39 = vor.u32 1.1754944e-38, %v1090_v9  ;;  %vm1089_vm5 = vcmp.eq.f32.partialorder %v1088_v60, 8.507059e+37 }
 0x2c5   : > { %v1110_v48 = vor.u32 1.1754944e-38, %v1109_v45  ;;  %vm1108_vm6 = vcmp.eq.f32.partialorder %v1107_v55, 8.507059e+37 }
 0x2c6   : > { %v2325_v52 = vpop.eup %2324 }
 0x2c7   : > { %v1117_v62 = vadd.f32 1.0, %v2325_v52 }
 0x2c8   : > { %v2327_v63 = vpop.eup %2326 }
 0x2c9   : > { %v2329_v61 = vpop.eup %2328  ;;  %v1080_v2 = vmul.f32 %v2327_v63, %v1078_v42  ;;  %2330 = vrcp.f32 %v1117_v62  ;;  %vm1085_vm15 = vweird.f32 %v2327_v63  ;;  %v1129_v12 = vand.u32 2147483648, %v1117_v62 }
 0x2ca   : > { %v1099_v3 = vmul.f32 %v2329_v61, %v1097_v43  ;;  %2332 = vtanh.f32 %v1073_v0  ;;  %vm1104_vm0 = vweird.f32 %v2329_v61  ;;  %vm1086_vm3 = vmor %vm1084_vm1, %vm1085_vm15  ;;  %vm1123_vm9 = vweird.f32 %v1117_v62 }
 0x2cb   : > { %v1081_v6 = vsub.f32 1.0, %v1080_v2  ;;  %vm1105_vm4 = vmor %vm1103_vm2, %vm1104_vm0  ;;  %v1127_v14 = vand.u32 2147483647, %v1117_v62  ;;  %v1130_v16 = vor.u32 1.1754944e-38, %v1129_v12 }
 0x2cc   : > { %v1100_v7 = vsub.f32 1.0, %v1099_v3 }
 0x2cd   : > { %v1082_v46 = vmul.f32 %v2327_v63, %v1081_v6  ;;  %vm1128_vm11 = vcmp.eq.f32.partialorder %v1127_v14, 8.507059e+37 }
 0x2ce   : > { %v1101_v4 = vmul.f32 %v2329_v61, %v1100_v7 }
 0x2cf   : > { %v2331_v1 = vpop.eup %2330  ;;  %v1083_v54 = vadd.f32 %v2327_v63, %v1082_v46 }
 0x2d0   : > { %v1102_v19 = vadd.f32 %v2329_v61, %v1101_v4  ;;  %v1119_v8 = vmul.f32 %v2331_v1, %v1117_v62  ;;  %v2333_v18 = vpop.eup %2332  ;;  %vm1124_vm8 = vweird.f32 %v2331_v1 }
 0x2d1   : > { %v1087_v11 = vsel %vm1086_vm3, %v2327_v63, %v1083_v54  ;;  %vm1125_vm10 = vmor %vm1123_vm9, %vm1124_vm8 }
 0x2d2   : > { %v1092_v20 = vsel %vm1089_vm5, %v1091_v39, %v1087_v11  ;;  %v1106_v10 = vsel %vm1105_vm4, %v2329_v61, %v1102_v19  ;;  %v1120_v57 = vsub.f32 1.0, %v1119_v8 }
 0x2d3   : > { %v1111_v26 = vsel %vm1108_vm6, %v1110_v48, %v1106_v10  ;;  %v1134_v27 = vmul.f32 %v2333_v18, %v1092_v20  ;;  %v1373_v18 = vpop.permute.xlu2 %1372 }
 0x2d4   : > { %v1133_v30 = vmul.f32 %v1111_v26, %v3517_v29  ;;  %v1121_v56 = vmul.f32 %v2331_v1, %v1120_v57  ;;  %vm1374_vm4 = vcmp.eq.s32.totalorder %v1373_v18, 1 }
 0x2d6   : > { %v1135_v49 = vadd.f32 %v1134_v27, %v1133_v30  ;;  %v1122_v5 = vadd.f32 %v2331_v1, %v1121_v56 }
 0x2d8   : > { %2334 = vtanh.f32 %v1135_v49  ;;  %v3634_v13 = vsel %vm1145_vm7, %v1135_v49, %v3517_v29  ;;  %v1126_v15 = vsel %vm1125_vm10, %v2331_v1, %v1122_v5  ;;  %v2208_v29 = vld [vmem:[%s2472_s22 + $0x80] sm:$0xff] }
 0x2d9   : > { %v1131_v22 = vsel %vm1128_vm11, %v1130_v16, %v1126_v15 }
 0x2de   : > { %v2335_v21 = vpop.eup %2334 }
 0x2df   : > { %v1137_v23 = vmul.f32 %v2335_v21, %v1131_v22 }
 0x2e1   : > { %v3638_v24 = vsel %vm1145_vm7, %v1137_v23, %v3542_v17  ;;  %v1148_v25 = vsel %vm1145_vm7, %v1137_v23, 0.0 }
 0x2e2   : > { %2207 = vst [vmem:[%s2477_s25 + $0x18] sm:$0xff] %v1148_v25  ;;  %1236 = vmatmul.f32.vlgmr.msra.gmra.mxu0 %v3638_v24  ;;  %1256 = vmatmul.f32.vlgmr.msra.gmra.mxu1 %v3638_v24  ;;  %v3678_v25 = vld [vmem:[%s4203_s2 + $0x1f0] sm:$0xff] }
 0x2e3   : > { %1276 = vmatmul.f32.vlgmr.msra.gmra.mxu2 %v3638_v24  ;;  %1296 = vmatmul.f32.vlgmr.msra.gmra.mxu3 %v3638_v24 }
 0x2e4   : > { %1718 = vmatpush.msra.mxu2 %v3678_v25 }
 0x35f   : > { %v1237_v32 = vpop.f32.mrf.mxu0  ;;  %v1257_v33 = vpop.f32.mrf.mxu1 }
 0x360   : > { %v1300_v34 = vadd.f32 %v2208_v29, %v1237_v32  ;;  %v1301_v35 = vadd.f32 %v2209_v28, %v1257_v33  ;;  %v3685_v29 = vld [vmem:[%s4203_s2 + $0x1f8] sm:$0xff]  ;;  %v3692_v28 = vld [vmem:[%s4203_s2 + $0x1c0] sm:$0xff]  ;;  %v3697_v32 = vld [vmem:[%s4203_s2 + $0x1c8] sm:$0xff] }
 0x361   : > { %1738 = vmatpush.msra.mxu3 %v3685_v29  ;;  %v3702_v33 = vld [vmem:[%s4203_s2 + $0x1d0] sm:$0xff] }
 0x362   : > { %v2212_v17 = vmul.f32 -1.442695, %v1300_v34  ;;  %v2213_v36 = vmul.f32 -1.442695, %v1301_v35  ;;  %v3709_v34 = vld [vmem:[%s4203_s2 + $0x1d8] sm:$0xff]  ;;  %1719 = vmatpush.msra.mxu2 %v3702_v33  ;;  %v3716_v35 = vld [vmem:[%s4203_s2 + $0x1a0] sm:$0xff] }
 0x363   : > { %1739 = vmatpush.msra.mxu3 %v3709_v34 }
 0x364   : > { %2336 = vpow2.f32 %v2212_v17  ;;  %v3721_v17 = vld [vmem:[%s4203_s2 + $0x1a8] sm:$0xff] }
 0x365   : > { %2338 = vpow2.f32 %v2213_v36  ;;  %v3726_v36 = vld [vmem:[%s4203_s2 + $0x1b0] sm:$0xff] }
 0x366   : > { %v1297_v38 = vpop.f32.mrf.mxu3  ;;  %v1277_v52 = vpop.f32.mrf.mxu2  ;;  %1720 = vmatpush.msra.mxu2 %v3726_v36 }
 0x367   : > { %v1303_v41 = vadd.f32 %v2211_v37, %v1297_v38  ;;  %v1302_v62 = vadd.f32 %v2210_v51, %v1277_v52  ;;  %v3733_v37 = vld [vmem:[%s4203_s2 + $0x1b8] sm:$0xff]  ;;  %v3740_v38 = vld [vmem:[%s4203_s2 + $0x180] sm:$0xff] }
 0x368   : > { %1740 = vmatpush.msra.mxu3 %v3733_v37  ;;  %v3781_v51 = vld [vmem:[%s4203_s2 + $0x178] sm:$0xff]  ;;  %v3788_v52 = vld [vmem:[%s4203_s2 + $0x140] sm:$0xff] }
 0x369   : > { %v2214_v42 = vmul.f32 -1.442695, %v1303_v41  ;;  %v3745_v41 = vld [vmem:[%s4203_s2 + $0x188] sm:$0xff] }
 0x36a   : > { %v2337_v43 = vpop.eup %2336 }
 0x36b   : > { %v2339_v44 = vpop.eup %2338  ;;  %v1307_v47 = vadd.f32 1.0, %v2337_v43  ;;  %2340 = vpow2.f32 %v2214_v42  ;;  %v3750_v42 = vld [vmem:[%s4203_s2 + $0x190] sm:$0xff]  ;;  %v3757_v43 = vld [vmem:[%s4203_s2 + $0x198] sm:$0xff] }
 0x36c   : > { %v1326_v50 = vadd.f32 1.0, %v2339_v44  ;;  %1721 = vmatpush.msra.mxu2 %v3750_v42  ;;  %1741 = vmatpush.msra.mxu3 %v3757_v43  ;;  %v3764_v44 = vld [vmem:[%s4203_s2 + $0x160] sm:$0xff] }
 0x36d   : > { %2342 = vrcp.f32 %v1307_v47  ;;  %v1319_v6 = vand.u32 2147483648, %v1307_v47  ;;  %v1317_v9 = vand.u32 2147483647, %v1307_v47  ;;  %vm1313_vm14 = vweird.f32 %v1307_v47 }
 0x36e   : > { %2344 = vrcp.f32 %v1326_v50  ;;  %v1338_v40 = vand.u32 2147483648, %v1326_v50  ;;  %v1336_v46 = vand.u32 2147483647, %v1326_v50  ;;  %vm1332_vm0 = vweird.f32 %v1326_v50  ;;  %1742 = vmatpush.msra.mxu3 %v3781_v51 }
 0x36f   : > { %v1320_v55 = vor.u32 1.1754944e-38, %v1319_v6  ;;  %vm1318_vm1 = vcmp.eq.f32.partialorder %v1317_v9, 8.507059e+37  ;;  %v3846_v6 = vld [vmem:[%s4203_s2 + $0x110] sm:$0xff]  ;;  %v2217_v9 = vld [vmem:[%s2472_s22 + $0xa8] sm:$0xff] }
 0x370   : > { %v1339_v19 = vor.u32 1.1754944e-38, %v1338_v40  ;;  %vm1337_vm3 = vcmp.eq.f32.partialorder %v1336_v46, 8.507059e+37  ;;  %v3855_v40 = vld [vmem:[%s4203_s2 + $0x118] sm:$0xff]  ;;  %v3867_v46 = vld [vmem:[%s4203_s2 + $0xe8] sm:$0xff] }
 0x371   : > { %v2341_v53 = vpop.eup %2340 }
 0x372   : > { %v1346_v58 = vadd.f32 1.0, %v2341_v53  ;;  %v3793_v53 = vld [vmem:[%s4203_s2 + $0x148] sm:$0xff] }
 0x373   : > { %v2343_v59 = vpop.eup %2342 }
 0x374   : > { %v2345_v63 = vpop.eup %2344  ;;  %v1309_v0 = vmul.f32 %v2343_v59, %v1307_v47  ;;  %2346 = vrcp.f32 %v1346_v58  ;;  %vm1314_vm12 = vweird.f32 %v2343_v59  ;;  %v1358_v31 = vand.u32 2147483648, %v1346_v58  ;;  %v3769_v47 = vld [vmem:[%s4203_s2 + $0x168] sm:$0xff] }
 0x375   : > { %v1328_v61 = vmul.f32 %v2345_v63, %v1326_v50  ;;  %2348 = vtanh.f32 %v1302_v62  ;;  %vm1333_vm13 = vweird.f32 %v2345_v63  ;;  %vm1315_vm15 = vmor %vm1313_vm14, %vm1314_vm12  ;;  %vm1352_vm6 = vweird.f32 %v1346_v58  ;;  %v3774_v50 = vld [vmem:[%s4203_s2 + $0x170] sm:$0xff]  ;;  %v3812_v62 = vld [vmem:[%s4203_s2 + $0x120] sm:$0xff] }
 0x376   : > { %v1310_v2 = vsub.f32 1.0, %v1309_v0  ;;  %vm1334_vm2 = vmor %vm1332_vm0, %vm1333_vm13  ;;  %v1356_v5 = vand.u32 2147483647, %v1346_v58  ;;  %v1359_v14 = vor.u32 1.1754944e-38, %v1358_v31  ;;  %1722 = vmatpush.msra.mxu2 %v3774_v50  ;;  %v3822_v0 = vld [vmem:[%s4203_s2 + $0x130] sm:$0xff]  ;;  %v3940_v31 = vld [vmem:[%s4203_s2 + $0x88] sm:$0xff] }
 0x377   : > { %v1329_v3 = vsub.f32 1.0, %v1328_v61  ;;  %v3829_v61 = vld [vmem:[%s4203_s2 + $0x138] sm:$0xff] }
 0x378   : > { %v1311_v7 = vmul.f32 %v2343_v59, %v1310_v2  ;;  %vm1357_vm8 = vcmp.eq.f32.partialorder %v1356_v5, 8.507059e+37  ;;  %v3836_v2 = vld [vmem:[%s4203_s2 + $0x100] sm:$0xff]  ;;  %v3945_v5 = vld [vmem:[%s4203_s2 + $0x90] sm:$0xff] }
 0x379   : > { %v1330_v45 = vmul.f32 %v2345_v63, %v1329_v3  ;;  %v3841_v3 = vld [vmem:[%s4203_s2 + $0x108] sm:$0xff] }
 0x37a   : > { %v2347_v60 = vpop.eup %2346  ;;  %v1312_v4 = vadd.f32 %v2343_v59, %v1311_v7  ;;  %v2216_v7 = vld [vmem:[%s2472_s22 + $0xa0] sm:$0xff] }
 0x37b   : > { %v1348_v1 = vmul.f32 %v2347_v60, %v1346_v58  ;;  %v1331_v54 = vadd.f32 %v2345_v63, %v1330_v45  ;;  %v2349_v8 = vpop.eup %2348  ;;  %vm1353_vm5 = vweird.f32 %v2347_v60  ;;  %v3798_v58 = vld [vmem:[%s4203_s2 + $0x150] sm:$0xff]  ;;  %v3862_v45 = vld [vmem:[%s4203_s2 + $0xe0] sm:$0xff] }
 0x37c   : > { %v1316_v39 = vsel %vm1315_vm15, %v2343_v59, %v1312_v4  ;;  %vm1354_vm7 = vmor %vm1352_vm6, %vm1353_vm5  ;;  %v3805_v59 = vld [vmem:[%s4203_s2 + $0x158] sm:$0xff]  ;;  %1723 = vmatpush.msra.mxu2 %v3798_v58 }
 0x37d   : > { %v1321_v48 = vsel %vm1318_vm1, %v1320_v55, %v1316_v39  ;;  %v1349_v11 = vsub.f32 1.0, %v1348_v1  ;;  %v1335_v20 = vsel %vm1334_vm2, %v2345_v63, %v1331_v54  ;;  %1743 = vmatpush.msra.mxu3 %v3805_v59  ;;  %v3817_v63 = vld [vmem:[%s4203_s2 + $0x128] sm:$0xff]  ;;  %v3879_v1 = vld [vmem:[%s4203_s2 + $0xf8] sm:$0xff] }
 0x37e   : > { %v1363_v10 = vmul.f32 %v2349_v8, %v1321_v48  ;;  %v1340_v57 = vsel %vm1337_vm3, %v1339_v19, %v1335_v20  ;;  %1724 = vmatpush.msra.mxu2 %v3822_v0  ;;  %v3886_v19 = vld [vmem:[%s4203_s2 + $0xc0] sm:$0xff]  ;;  %v3891_v8 = vld [vmem:[%s4203_s2 + $0xc8] sm:$0xff]  ;;  %v3896_v48 = vld [vmem:[%s4203_s2 + $0xd0] sm:$0xff] }
 0x37f   : > { %v1350_v26 = vmul.f32 %v2347_v60, %v1349_v11  ;;  %v1362_v27 = vmul.f32 %v1340_v57, %v3634_v13  ;;  %1744 = vmatpush.msra.mxu3 %v3829_v61  ;;  %v3903_v11 = vld [vmem:[%s4203_s2 + $0xd8] sm:$0xff]  ;;  %v3911_v57 = vld [vmem:[%s4203_s2 + $0xa0] sm:$0xff] }
 0x380   : > { %1725 = vmatpush.msra.mxu2 %v3846_v6 }
 0x381   : > { %v1364_v30 = vadd.f32 %v1363_v10, %v1362_v27  ;;  %v1351_v56 = vadd.f32 %v2347_v60, %v1350_v26  ;;  %1745 = vmatpush.msra.mxu3 %v3855_v40  ;;  %v2219_v10 = vld [vmem:[%s2472_s22 + $0xb8] sm:$0xff]  ;;  %v3916_v26 = vld [vmem:[%s4203_s2 + $0xa8] sm:$0xff]  ;;  %v3923_v27 = vld [vmem:[%s4203_s2 + $0xb0] sm:$0xff] }
 0x383   : > { %2350 = vtanh.f32 %v1364_v30  ;;  %v3653_v49 = vsel %vm1374_vm4, %v1364_v30, %v3634_v13  ;;  %v1355_v12 = vsel %vm1354_vm7, %v2347_v60, %v1351_v56  ;;  %v3668_v13 = vld [vmem:[%s4203_s2 + $0x1e0] sm:$0xff]  ;;  %v3872_v60 = vld [vmem:[%s4203_s2 + $0xf0] sm:$0xff]  ;;  %1746 = vmatpush.msra.mxu3 %v3879_v1  ;;  %v3928_v30 = vld [vmem:[%s4203_s2 + $0xb8] sm:$0xff] }
 0x384   : > { %v1360_v16 = vsel %vm1357_vm8, %v1359_v14, %v1355_v12  ;;  %1678 = vmatpush.msra.mxu0 %v3668_v13  ;;  %1726 = vmatpush.msra.mxu2 %v3872_v60  ;;  %v3933_v56 = vld [vmem:[%s4203_s2 + $0x80] sm:$0xff]  ;;  %v3950_v12 = vld [vmem:[%s4203_s2 + $0x98] sm:$0xff] }
 0x385   : > { %1747 = vmatpush.msra.mxu3 %v3903_v11  ;;  %v3957_v14 = vld [vmem:[%s4203_s2 + $0x60] sm:$0xff] }
 0x386   : > { %1679 = vmatpush.msra.mxu0 %v3692_v28  ;;  %1727 = vmatpush.msra.mxu2 %v3896_v48 }
 0x387   : > { %1748 = vmatpush.msra.mxu3 %v3928_v30 }
 0x388   : > { %1680 = vmatpush.msra.mxu0 %v3716_v35  ;;  %1728 = vmatpush.msra.mxu2 %v3923_v27 }
 0x389   : > { %v2351_v15 = vpop.eup %2350  ;;  %1749 = vmatpush.msra.mxu3 %v3950_v12 }
 0x38a   : > { %v1366_v21 = vmul.f32 %v2351_v15, %v1360_v16  ;;  %1681 = vmatpush.msra.mxu0 %v3740_v38  ;;  %v3962_v15 = vld [vmem:[%s4203_s2 + $0x68] sm:$0xff]  ;;  %v3967_v16 = vld [vmem:[%s4203_s2 + $0x70] sm:$0xff]  ;;  %1729 = vmatpush.msra.mxu2 %v3945_v5 }
 0x38b   : > { %4317 = vst [vmem:[#allocation18_spill] sm:$0xff] %v3967_v16 }
 0x38c   : > { %v3657_v22 = vsel %vm1374_vm4, %v1366_v21, %v3638_v24  ;;  %v1377_v23 = vsel %vm1374_vm4, %v1366_v21, 0.0  ;;  %v3673_v24 = vld [vmem:[%s4203_s2 + $0x1e8] sm:$0xff]  ;;  %1682 = vmatpush.msra.mxu0 %v3764_v44  ;;  %1730 = vmatpush.msra.mxu2 %v3967_v16 }
 0x38d   : > { %4316 = vst [vmem:[#allocation17_spill] sm:$0xff] %v3657_v22  ;;  %1465 = vmatmul.f32.vlgmr.msrb.gmra.mxu0 %v3657_v22  ;;  %1485 = vmatmul.f32.vlgmr.msrb.gmra.mxu1 %v3657_v22 }
 0x38e   : > { %2215 = vst [vmem:[%s2477_s25 + $0x20] sm:$0xff] %v1377_v23  ;;  %1505 = vmatmul.f32.vlgmr.msrb.gmra.mxu2 %v3657_v22  ;;  %1525 = vmatmul.f32.vlgmr.msrb.gmra.mxu3 %v3657_v22  ;;  %v3974_v23 = vld [vmem:[%s4203_s2 + $0x78] sm:$0xff] }
 0x38f   : > { %1698 = vmatpush.msra.mxu1 %v3673_v24  ;;  %1683 = vmatpush.msra.mxu0 %v3788_v52  ;;  %4318 = vst [vmem:[#allocation19_spill] sm:$0xff] %v3974_v23 }
 0x390   : > { %1750 = vmatpush.msra.mxu3 %v3974_v23 }
 0x391   : > { %1699 = vmatpush.msra.mxu1 %v3697_v32  ;;  %1684 = vmatpush.msra.mxu0 %v3812_v62 }
 0x393   : > { %1700 = vmatpush.msra.mxu1 %v3721_v17  ;;  %1685 = vmatpush.msra.mxu0 %v3836_v2 }
 0x395   : > { %1701 = vmatpush.msra.mxu1 %v3745_v41  ;;  %1686 = vmatpush.msra.mxu0 %v3862_v45 }
 0x397   : > { %1702 = vmatpush.msra.mxu1 %v3769_v47  ;;  %1687 = vmatpush.msra.mxu0 %v3886_v19 }
 0x399   : > { %1703 = vmatpush.msra.mxu1 %v3793_v53  ;;  %1688 = vmatpush.msra.mxu0 %v3911_v57 }
 0x39b   : > { %1704 = vmatpush.msra.mxu1 %v3817_v63  ;;  %1689 = vmatpush.msra.mxu0 %v3933_v56 }
 0x39d   : > { %1705 = vmatpush.msra.mxu1 %v3841_v3  ;;  %1690 = vmatpush.msra.mxu0 %v3957_v14 }
 0x39f   : > { %1706 = vmatpush.msra.mxu1 %v3867_v46 }
 0x3a1   : > { %1707 = vmatpush.msra.mxu1 %v3891_v8 }
 0x3a3   : > { %1708 = vmatpush.msra.mxu1 %v3916_v26 }
 0x3a5   : > { %1709 = vmatpush.msra.mxu1 %v3940_v31 }
 0x3a7   : > { %1710 = vmatpush.msra.mxu1 %v3962_v15 }
 0x40a   : > { %v1466_v4 = vpop.f32.mrf.mxu0  ;;  %v1486_v55 = vpop.f32.mrf.mxu1 }
 0x40b   : > { %v1529_v54 = vadd.f32 %v2216_v7, %v1466_v4  ;;  %v1530_v39 = vadd.f32 %v2217_v9, %v1486_v55  ;;  %v3979_v7 = vld [vmem:[%s4203_s2 + $0x40] sm:$0xff]  ;;  %v3984_v9 = vld [vmem:[%s4203_s2 + $0x48] sm:$0xff]  ;;  %v3991_v55 = vld [vmem:[%s4203_s2 + $0x50] sm:$0xff] }
 0x40c   : > { %4319 = vst [vmem:[#allocation6_spill] sm:$0xff] %v3979_v7  ;;  %1691 = vmatpush.msra.mxu0 %v3979_v7  ;;  %1711 = vmatpush.msra.mxu1 %v3984_v9 }
 0x40d   : > { %v2220_v18 = vmul.f32 -1.442695, %v1529_v54  ;;  %v2221_v20 = vmul.f32 -1.442695, %v1530_v39  ;;  %4320 = vst [vmem:[#allocation20_spill] sm:$0xff] %v3984_v9  ;;  %v3996_v54 = vld [vmem:[%s4203_s2 + $0x58] sm:$0xff]  ;;  %1731 = vmatpush.msra.mxu2 %v3991_v55 }
 0x40e   : > { %4321 = vst [vmem:[#allocation21_spill] sm:$0xff] %v3991_v55  ;;  %v4003_v39 = vld [vmem:[%s4203_s2 + $0x20] sm:$0xff]  ;;  %1751 = vmatpush.msra.mxu3 %v3996_v54  ;;  %v4032_v9 = vld [vmem:[%s4203_s2 + $0x8] sm:$0xff]  ;;  %v4046_v55 = vld [vmem:[%s4203_s2 + $0x18] sm:$0xff] }
 0x40f   : > { %2352 = vpow2.f32 %v2220_v18  ;;  %4322 = vst [vmem:[#allocation22_spill] sm:$0xff] %v3996_v54  ;;  %v4008_v18 = vld [vmem:[%s4203_s2 + $0x28] sm:$0xff]  ;;  %1692 = vmatpush.msra.mxu0 %v4003_v39  ;;  %v4041_v54 = vld [vmem:[%s4203_s2 + $0x10] sm:$0xff] }
 0x410   : > { %2354 = vpow2.f32 %v2221_v20  ;;  %4323 = vst [vmem:[#allocation23_spill] sm:$0xff] %v4032_v9  ;;  %1712 = vmatpush.msra.mxu1 %v4008_v18 }
 0x411   : > { %v1526_v21 = vpop.f32.mrf.mxu3  ;;  %4324 = vst [vmem:[#allocation24_spill] sm:$0xff] %v4046_v55 }
 0x412   : > { %v1532_v4 = vadd.f32 %v2219_v10, %v1526_v21  ;;  %v4015_v10 = vld [vmem:[%s4203_s2 + $0x30] sm:$0xff]  ;;  %v4020_v21 = vld [vmem:[%s4203_s2 + $0x38] sm:$0xff]  ;;  %1713 = vmatpush.msra.mxu1 %v4032_v9 }
 0x413   : > { %1732 = vmatpush.msra.mxu2 %v4015_v10  ;;  %1752 = vmatpush.msra.mxu3 %v4020_v21 }
 0x414   : > { %v2222_v20 = vmul.f32 -1.442695, %v1532_v4  ;;  %v4027_v4 = vld [vmem:[%s4203_s2] sm:$0xff]  ;;  %1927 = vmatpush.msrb.mxu1 %v3673_v24 }
 0x415   : > { %v2353_v22 = vpop.eup %2352  ;;  %1693 = vmatpush.msra.mxu0 %v4027_v4  ;;  %1733 = vmatpush.msra.mxu2 %v4041_v54 }
 0x416   : > { %v2355_v7 = vpop.eup %2354  ;;  %v4034_v23 = vadd.f32 1.0, %v2353_v22  ;;  %2356 = vpow2.f32 %v2222_v20  ;;  %1753 = vmatpush.msra.mxu3 %v4046_v55  ;;  %v2218_v22 = vld [vmem:[%s2472_s22 + $0xb0] sm:$0xff]  ;;  %1928 = vmatpush.msrb.mxu1 %v3697_v32 }
 0x417   : > { %v4048_v16 = vadd.f32 1.0, %v2355_v7  ;;  %1907 = vmatpush.msrb.mxu0 %v3668_v13  ;;  %v1506_v7 = vpop.f32.mrf.mxu2  ;;  %1947 = vmatpush.msrb.mxu2 %v3678_v25 }
 0x418   : > { %2358 = vrcp.f32 %v4034_v23  ;;  %1967 = vmatpush.msrb.mxu3 %v3685_v29  ;;  %v1531_v55 = vadd.f32 %v2218_v22, %v1506_v7  ;;  %1929 = vmatpush.msrb.mxu1 %v3721_v17  ;;  %v1546_v17 = vand.u32 2147483647, %v4034_v23  ;;  %vm1542_vm11 = vweird.f32 %v4034_v23 }
 0x419   : > { %2360 = vrcp.f32 %v4048_v16  ;;  %1908 = vmatpush.msrb.mxu0 %v3692_v28  ;;  %1948 = vmatpush.msrb.mxu2 %v3702_v33  ;;  %v1548_v33 = vand.u32 2147483648, %v4034_v23  ;;  %vm1561_vm12 = vweird.f32 %v4048_v16 }
 0x41a   : > { %1968 = vmatpush.msrb.mxu3 %v3709_v34  ;;  %1930 = vmatpush.msrb.mxu1 %v3745_v41  ;;  %v1567_v34 = vand.u32 2147483648, %v4048_v16  ;;  %vm1547_vm15 = vcmp.eq.f32.partialorder %v1546_v17, 8.507059e+37 }
 0x41b   : > { %1909 = vmatpush.msrb.mxu0 %v3716_v35  ;;  %1949 = vmatpush.msrb.mxu2 %v3726_v36 }
 0x41c   : > { %v2357_v20 = vpop.eup %2356  ;;  %1969 = vmatpush.msrb.mxu3 %v3733_v37  ;;  %1931 = vmatpush.msrb.mxu1 %v3769_v47  ;;  %v1565_v37 = vand.u32 2147483647, %v4048_v16  ;;  %v1568_v47 = vor.u32 1.1754944e-38, %v1567_v34 }
 0x41d   : > { %v4065_v9 = vadd.f32 1.0, %v2357_v20  ;;  %1910 = vmatpush.msrb.mxu0 %v3740_v38  ;;  %1950 = vmatpush.msrb.mxu2 %v3750_v42  ;;  %v1549_v42 = vor.u32 1.1754944e-38, %v1548_v33 }
 0x41e   : > { %v2359_v13 = vpop.eup %2358  ;;  %1970 = vmatpush.msrb.mxu3 %v3757_v43  ;;  %1932 = vmatpush.msrb.mxu1 %v3793_v53  ;;  %vm1566_vm0 = vcmp.eq.f32.partialorder %v1565_v37, 8.507059e+37 }
 0x41f   : > { %v2361_v24 = vpop.eup %2360  ;;  %v1538_v25 = vmul.f32 %v2359_v13, %v4034_v23  ;;  %2362 = vrcp.f32 %v4065_v9  ;;  %1911 = vmatpush.msrb.mxu0 %v3764_v44  ;;  %vm1543_vm9 = vweird.f32 %v2359_v13  ;;  %1951 = vmatpush.msrb.mxu2 %v3774_v50  ;;  %vm1581_vm3 = vweird.f32 %v4065_v9 }
 0x420   : > { %v1557_v29 = vmul.f32 %v2361_v24, %v4048_v16  ;;  %2364 = vtanh.f32 %v1531_v55  ;;  %1971 = vmatpush.msrb.mxu3 %v3781_v51  ;;  %vm1562_vm10 = vweird.f32 %v2361_v24  ;;  %vm1544_vm13 = vmor %vm1542_vm11, %vm1543_vm9  ;;  %1933 = vmatpush.msrb.mxu1 %v3817_v63  ;;  %v1602_v63 = vpop.permute.xlu2 %1601 }
 0x421   : > { %v1539_v28 = vsub.f32 1.0, %v1538_v25  ;;  %1912 = vmatpush.msrb.mxu0 %v3788_v52  ;;  %1952 = vmatpush.msrb.mxu2 %v3798_v58  ;;  %vm1563_vm14 = vmor %vm1561_vm12, %vm1562_vm10  ;;  %vm1603_vm1 = vcmp.eq.s32.totalorder %v1602_v63, 1 }
 0x422   : > { %v1558_v32 = vsub.f32 1.0, %v1557_v29  ;;  %1972 = vmatpush.msrb.mxu3 %v3805_v59  ;;  %1934 = vmatpush.msrb.mxu1 %v3841_v3 }
 0x423   : > { %v1540_v35 = vmul.f32 %v2359_v13, %v1539_v28  ;;  %1913 = vmatpush.msrb.mxu0 %v3812_v62  ;;  %1953 = vmatpush.msrb.mxu2 %v3822_v0 }
 0x424   : > { %v1559_v36 = vmul.f32 %v2361_v24, %v1558_v32  ;;  %1973 = vmatpush.msrb.mxu3 %v3829_v61  ;;  %1935 = vmatpush.msrb.mxu1 %v3867_v46 }
 0x425   : > { %v4090_v38 = vpop.eup %2362  ;;  %v1541_v41 = vadd.f32 %v2359_v13, %v1540_v35  ;;  %1914 = vmatpush.msrb.mxu0 %v3836_v2  ;;  %1954 = vmatpush.msrb.mxu2 %v3846_v6  ;;  %v1587_v6 = vand.u32 2147483648, %v4065_v9 }
 0x426   : > { %v1560_v43 = vadd.f32 %v2361_v24, %v1559_v36  ;;  %v1577_v44 = vmul.f32 %v4090_v38, %v4065_v9  ;;  %v2365_v51 = vpop.eup %2364  ;;  %1974 = vmatpush.msrb.mxu3 %v3855_v40  ;;  %1936 = vmatpush.msrb.mxu1 %v3891_v8  ;;  %vm1582_vm2 = vweird.f32 %v4090_v38 }
 0x427   : > { %v1545_v50 = vsel %vm1544_vm13, %v2359_v13, %v1541_v41  ;;  %1915 = vmatpush.msrb.mxu0 %v3862_v45  ;;  %1955 = vmatpush.msrb.mxu2 %v3872_v60  ;;  %v1585_v45 = vand.u32 2147483647, %v4065_v9  ;;  %vm1583_vm4 = vmor %vm1581_vm3, %vm1582_vm2  ;;  %v1588_v46 = vor.u32 1.1754944e-38, %v1587_v6  ;;  %v4325_v60 = vld [vmem:[#allocation18_spill] sm:$0xff] }
 0x428   : > { %v1550_v52 = vsel %vm1547_vm15, %v1549_v42, %v1545_v50  ;;  %v1564_v53 = vsel %vm1563_vm14, %v2361_v24, %v1560_v43  ;;  %v1578_v58 = vsub.f32 1.0, %v1577_v44  ;;  %1975 = vmatpush.msrb.mxu3 %v3879_v1  ;;  %1937 = vmatpush.msrb.mxu1 %v3916_v26  ;;  %v4326_v1 = vld [vmem:[#allocation19_spill] sm:$0xff]  ;;  %v4329_v26 = vld [vmem:[#allocation21_spill] sm:$0xff]  ;;  %v2226_v24 = vld [vmem:[%s2472_s22 + $0xd0] sm:$0xff] }
 0x429   : > { %v1569_v59 = vsel %vm1566_vm0, %v1568_v47, %v1564_v53  ;;  %v1592_v62 = vmul.f32 %v2365_v51, %v1550_v52  ;;  %1916 = vmatpush.msrb.mxu0 %v3886_v19  ;;  %1956 = vmatpush.msrb.mxu2 %v3896_v48  ;;  %vm1586_vm5 = vcmp.eq.f32.partialorder %v1585_v45, 8.507059e+37  ;;  %v4327_v48 = vld [vmem:[#allocation6_spill] sm:$0xff]  ;;  %v1831_v45 = vpop.permute.xlu0 %1830 }
 0x42a   : > { %v1591_v0 = vmul.f32 %v1569_v59, %v3653_v49  ;;  %v1579_v61 = vmul.f32 %v4090_v38, %v1578_v58  ;;  %1976 = vmatpush.msrb.mxu3 %v3903_v11  ;;  %1938 = vmatpush.msrb.mxu1 %v3940_v31  ;;  %v4328_v11 = vld [vmem:[#allocation20_spill] sm:$0xff]  ;;  %vm1832_vm14 = vcmp.eq.s32.totalorder %v1831_v45, 1 }
 0x42b   : > { %1917 = vmatpush.msrb.mxu0 %v3911_v57  ;;  %1957 = vmatpush.msrb.mxu2 %v3923_v27  ;;  %v4330_v27 = vld [vmem:[#allocation22_spill] sm:$0xff] }
 0x42c   : > { %v1593_v2 = vadd.f32 %v1592_v62, %v1591_v0  ;;  %v1580_v3 = vadd.f32 %v4090_v38, %v1579_v61  ;;  %1977 = vmatpush.msrb.mxu3 %v3928_v30  ;;  %1939 = vmatpush.msrb.mxu1 %v3962_v15  ;;  %v4331_v30 = vld [vmem:[#allocation17_spill] sm:$0xff]  ;;  %v2225_v15 = vld [vmem:[%s2472_s22 + $0xc8] sm:$0xff] }
 0x42d   : > { %1918 = vmatpush.msrb.mxu0 %v3933_v56  ;;  %1958 = vmatpush.msrb.mxu2 %v3945_v5  ;;  %v4332_v5 = vld [vmem:[#allocation23_spill] sm:$0xff] }
 0x42e   : > { %2366 = vtanh.f32 %v1593_v2  ;;  %v4123_v40 = vsel %vm1603_vm1, %v1593_v2, %v3653_v49  ;;  %v1584_v49 = vsel %vm1583_vm4, %v4090_v38, %v1580_v3  ;;  %1978 = vmatpush.msrb.mxu3 %v3950_v12  ;;  %1940 = vmatpush.msrb.mxu1 %v4328_v11  ;;  %v4333_v12 = vld [vmem:[#allocation24_spill] sm:$0xff] }
 0x42f   : > { %1919 = vmatpush.msrb.mxu0 %v3957_v14  ;;  %1959 = vmatpush.msrb.mxu2 %v4325_v60  ;;  %v1589_v8 = vsel %vm1586_vm5, %v1588_v46, %v1584_v49  ;;  %v2224_v14 = vld [vmem:[%s2472_s22 + $0xc0] sm:$0xff] }
 0x430   : > { %1979 = vmatpush.msrb.mxu3 %v4326_v1  ;;  %1941 = vmatpush.msrb.mxu1 %v4008_v18 }
 0x431   : > { %1920 = vmatpush.msrb.mxu0 %v4327_v48  ;;  %1960 = vmatpush.msrb.mxu2 %v4329_v26 }
 0x432   : > { %1980 = vmatpush.msrb.mxu3 %v4330_v27  ;;  %1942 = vmatpush.msrb.mxu1 %v4332_v5 }
 0x433   : > { %1921 = vmatpush.msrb.mxu0 %v4003_v39  ;;  %1961 = vmatpush.msrb.mxu2 %v4015_v10  ;;  %v2227_v10 = vld [vmem:[%s2472_s22 + $0xd8] sm:$0xff] }
 0x434   : > { %v2367_v19 = vpop.eup %2366  ;;  %1981 = vmatpush.msrb.mxu3 %v4020_v21 }
 0x435   : > { %v1595_v57 = vmul.f32 %v2367_v19, %v1589_v8  ;;  %1922 = vmatpush.msrb.mxu0 %v4027_v4  ;;  %1962 = vmatpush.msrb.mxu2 %v4041_v54 }
 0x436   : > { %1982 = vmatpush.msrb.mxu3 %v4333_v12  ;;  %v2233_v12 = vld [vmem:[%s2472_s22 + $0xe8] sm:$0xff] }
 0x437   : > { %v4148_v56 = vsel %vm1603_vm1, %v1595_v57, %v4331_v30  ;;  %v1606_v31 = vsel %vm1603_vm1, %v1595_v57, 0.0 }
 0x438   : > { %2223 = vst [vmem:[%s2477_s25 + $0x28] sm:$0xff] %v1606_v31  ;;  %1694 = vmatmul.f32.vlgmr.msra.gmra.mxu0 %v4148_v56  ;;  %1714 = vmatmul.f32.vlgmr.msra.gmra.mxu1 %v4148_v56 }
 0x439   : > { %1734 = vmatmul.f32.vlgmr.msra.gmra.mxu2 %v4148_v56  ;;  %1754 = vmatmul.f32.vlgmr.msra.gmra.mxu3 %v4148_v56 }
 0x4b5   : > { %v1695_v16 = vpop.f32.mrf.mxu0  ;;  %v1715_v23 = vpop.f32.mrf.mxu1 }
 0x4b6   : > { %v1758_v9 = vadd.f32 %v2224_v14, %v1695_v16  ;;  %v1759_v55 = vadd.f32 %v2225_v15, %v1715_v23 }
 0x4b8   : > { %v2228_v39 = vmul.f32 -1.442695, %v1758_v9  ;;  %v2229_v18 = vmul.f32 -1.442695, %v1759_v55  ;;  %v2235_v55 = vld [vmem:[%s2472_s22 + $0xf8] sm:$0xff] }
 0x4ba   : > { %2368 = vpow2.f32 %v2228_v39 }
 0x4bb   : > { %2370 = vpow2.f32 %v2229_v18 }
 0x4bc   : > { %v1755_v21 = vpop.f32.mrf.mxu3  ;;  %v1735_v25 = vpop.f32.mrf.mxu2 }
 0x4bd   : > { %v1761_v4 = vadd.f32 %v2227_v10, %v1755_v21  ;;  %v1760_v33 = vadd.f32 %v2226_v24, %v1735_v25 }
 0x4bf   : > { %v2230_v22 = vmul.f32 -1.442695, %v1761_v4 }
 0x4c0   : > { %v2369_v7 = vpop.eup %2368 }
 0x4c1   : > { %v2371_v20 = vpop.eup %2370  ;;  %v1765_v54 = vadd.f32 1.0, %v2369_v7  ;;  %2372 = vpow2.f32 %v2230_v22 }
 0x4c2   : > { %v1784_v13 = vadd.f32 1.0, %v2371_v20  ;;  %v2234_v20 = vld [vmem:[%s2472_s22 + $0xf0] sm:$0xff] }
 0x4c3   : > { %2374 = vrcp.f32 %v1765_v54  ;;  %v1777_v38 = vand.u32 2147483648, %v1765_v54  ;;  %v1775_v43 = vand.u32 2147483647, %v1765_v54  ;;  %vm1771_vm8 = vweird.f32 %v1765_v54 }
 0x4c4   : > { %2376 = vrcp.f32 %v1784_v13  ;;  %v1796_v41 = vand.u32 2147483648, %v1784_v13  ;;  %v1794_v47 = vand.u32 2147483647, %v1784_v13  ;;  %vm1790_vm9 = vweird.f32 %v1784_v13 }
 0x4c5   : > { %v1778_v52 = vor.u32 1.1754944e-38, %v1777_v38  ;;  %vm1776_vm12 = vcmp.eq.f32.partialorder %v1775_v43, 8.507059e+37 }
 0x4c6   : > { %v1797_v59 = vor.u32 1.1754944e-38, %v1796_v41  ;;  %vm1795_vm13 = vcmp.eq.f32.partialorder %v1794_v47, 8.507059e+37 }
 0x4c7   : > { %v2373_v29 = vpop.eup %2372 }
 0x4c8   : > { %v1804_v28 = vadd.f32 1.0, %v2373_v29 }
 0x4c9   : > { %v2375_v32 = vpop.eup %2374 }
 0x4ca   : > { %v2377_v34 = vpop.eup %2376  ;;  %v1767_v35 = vmul.f32 %v2375_v32, %v1765_v54  ;;  %2378 = vrcp.f32 %v1804_v28  ;;  %vm1772_vm6 = vweird.f32 %v2375_v32  ;;  %v1816_v19 = vand.u32 2147483648, %v1804_v28 }
 0x4cb   : > { %v1786_v17 = vmul.f32 %v2377_v34, %v1784_v13  ;;  %2380 = vtanh.f32 %v1760_v33  ;;  %vm1791_vm7 = vweird.f32 %v2377_v34  ;;  %vm1773_vm10 = vmor %vm1771_vm8, %vm1772_vm6  ;;  %vm1810_vm0 = vweird.f32 %v1804_v28 }
 0x4cc   : > { %v1768_v36 = vsub.f32 1.0, %v1767_v35  ;;  %vm1792_vm11 = vmor %vm1790_vm9, %vm1791_vm7  ;;  %v1814_v48 = vand.u32 2147483647, %v1804_v28  ;;  %v1817_v57 = vor.u32 1.1754944e-38, %v1816_v19 }
 0x4cd   : > { %v1787_v37 = vsub.f32 1.0, %v1786_v17 }
 0x4ce   : > { %v1769_v42 = vmul.f32 %v2375_v32, %v1768_v36  ;;  %vm1815_vm2 = vcmp.eq.f32.partialorder %v1814_v48, 8.507059e+37 }
 0x4cf   : > { %v1788_v44 = vmul.f32 %v2377_v34, %v1787_v37 }
 0x4d0   : > { %v2379_v50 = vpop.eup %2378  ;;  %v1770_v51 = vadd.f32 %v2375_v32, %v1769_v42 }
 0x4d1   : > { %v1789_v53 = vadd.f32 %v2377_v34, %v1788_v44  ;;  %v1806_v58 = vmul.f32 %v2379_v50, %v1804_v28  ;;  %v2381_v63 = vpop.eup %2380  ;;  %vm1811_vm15 = vweird.f32 %v2379_v50 }
 0x4d2   : > { %v1774_v62 = vsel %vm1773_vm10, %v2375_v32, %v1770_v51  ;;  %vm1812_vm1 = vmor %vm1810_vm0, %vm1811_vm15 }
 0x4d3   : > { %v1779_v0 = vsel %vm1776_vm12, %v1778_v52, %v1774_v62  ;;  %v1793_v61 = vsel %vm1792_vm11, %v2377_v34, %v1789_v53  ;;  %v1807_v2 = vsub.f32 1.0, %v1806_v58 }
 0x4d4   : > { %v1798_v3 = vsel %vm1795_vm13, %v1797_v59, %v1793_v61  ;;  %v1821_v6 = vmul.f32 %v2381_v63, %v1779_v0 }
 0x4d5   : > { %v1820_v49 = vmul.f32 %v1798_v3, %v4123_v40  ;;  %v1808_v46 = vmul.f32 %v2379_v50, %v1807_v2  ;;  %v2060_v2 = vpop.permute.xlu1 %2059 }
 0x4d6   : > { %vm2061_vm11 = vcmp.eq.s32.totalorder %v2060_v2, 1 }
 0x4d7   : > { %v1822_v60 = vadd.f32 %v1821_v6, %v1820_v49  ;;  %v1809_v1 = vadd.f32 %v2379_v50, %v1808_v46 }
 0x4d9   : > { %2382 = vtanh.f32 %v1822_v60  ;;  %v4169_v8 = vsel %vm1832_vm14, %v1822_v60, %v4123_v40  ;;  %v1813_v11 = vsel %vm1812_vm1, %v2379_v50, %v1809_v1  ;;  %v2232_v40 = vld [vmem:[%s2472_s22 + $0xe0] sm:$0xff] }
 0x4da   : > { %v1818_v27 = vsel %vm1815_vm2, %v1817_v57, %v1813_v11 }
 0x4df   : > { %v2383_v26 = vpop.eup %2382 }
 0x4e0   : > { %v1824_v30 = vmul.f32 %v2383_v26, %v1818_v27 }
 0x4e2   : > { %v4173_v31 = vsel %vm1832_vm14, %v1824_v30, %v4148_v56  ;;  %v1835_v5 = vsel %vm1832_vm14, %v1824_v30, 0.0 }
 0x4e3   : > { %2231 = vst [vmem:[%s2477_s25 + $0x30] sm:$0xff] %v1835_v5  ;;  %1923 = vmatmul.f32.vlgmr.msrb.gmra.mxu0 %v4173_v31  ;;  %1943 = vmatmul.f32.vlgmr.msrb.gmra.mxu1 %v4173_v31 }
 0x4e4   : > { %1963 = vmatmul.f32.vlgmr.msrb.gmra.mxu2 %v4173_v31  ;;  %1983 = vmatmul.f32.vlgmr.msrb.gmra.mxu3 %v4173_v31 }
 0x560   : > { %v1924_v14 = vpop.f32.mrf.mxu0  ;;  %v1944_v15 = vpop.f32.mrf.mxu1 }
 0x561   : > { %v1987_v16 = vadd.f32 %v2232_v40, %v1924_v14  ;;  %v1988_v23 = vadd.f32 %v2233_v12, %v1944_v15 }
 0x563   : > { %v2236_v56 = vmul.f32 -1.442695, %v1987_v16  ;;  %v2237_v9 = vmul.f32 -1.442695, %v1988_v23 }
 0x565   : > { %2384 = vpow2.f32 %v2236_v56 }
 0x566   : > { %2386 = vpow2.f32 %v2237_v9 }
 0x567   : > { %v1984_v39 = vpop.f32.mrf.mxu3  ;;  %v1964_v54 = vpop.f32.mrf.mxu2 }
 0x568   : > { %v1990_v18 = vadd.f32 %v2235_v55, %v1984_v39  ;;  %v1989_v29 = vadd.f32 %v2234_v20, %v1964_v54 }
 0x56a   : > { %v2238_v10 = vmul.f32 -1.442695, %v1990_v18 }
 0x56b   : > { %v2385_v21 = vpop.eup %2384 }
 0x56c   : > { %v2387_v4 = vpop.eup %2386  ;;  %v1994_v22 = vadd.f32 1.0, %v2385_v21  ;;  %2388 = vpow2.f32 %v2238_v10 }
 0x56d   : > { %v2013_v7 = vadd.f32 1.0, %v2387_v4 }
 0x56e   : > { %2390 = vrcp.f32 %v1994_v22  ;;  %v2006_v17 = vand.u32 2147483648, %v1994_v22  ;;  %v2004_v38 = vand.u32 2147483647, %v1994_v22  ;;  %vm2000_vm5 = vweird.f32 %v1994_v22 }
 0x56f   : > { %2392 = vrcp.f32 %v2013_v7  ;;  %v2025_v36 = vand.u32 2147483648, %v2013_v7  ;;  %v2023_v42 = vand.u32 2147483647, %v2013_v7  ;;  %vm2019_vm6 = vweird.f32 %v2013_v7 }
 0x570   : > { %v2007_v47 = vor.u32 1.1754944e-38, %v2006_v17  ;;  %vm2005_vm9 = vcmp.eq.f32.partialorder %v2004_v38, 8.507059e+37 }
 0x571   : > { %v2026_v52 = vor.u32 1.1754944e-38, %v2025_v36  ;;  %vm2024_vm10 = vcmp.eq.f32.partialorder %v2023_v42, 8.507059e+37 }
 0x572   : > { %v2389_v13 = vpop.eup %2388 }
 0x573   : > { %v2033_v24 = vadd.f32 1.0, %v2389_v13 }
 0x574   : > { %v2391_v25 = vpop.eup %2390 }
 0x575   : > { %v2393_v28 = vpop.eup %2392  ;;  %v1996_v32 = vmul.f32 %v2391_v25, %v1994_v22  ;;  %2394 = vrcp.f32 %v2033_v24  ;;  %vm2001_vm3 = vweird.f32 %v2391_v25  ;;  %v2045_v60 = vand.u32 2147483648, %v2033_v24 }
 0x576   : > { %v2015_v33 = vmul.f32 %v2393_v28, %v2013_v7  ;;  %2396 = vtanh.f32 %v1989_v29  ;;  %vm2020_vm4 = vweird.f32 %v2393_v28  ;;  %vm2002_vm7 = vmor %vm2000_vm5, %vm2001_vm3  ;;  %vm2039_vm13 = vweird.f32 %v2033_v24 }
 0x577   : > { %v1997_v34 = vsub.f32 1.0, %v1996_v32  ;;  %vm2021_vm8 = vmor %vm2019_vm6, %vm2020_vm4  ;;  %v2043_v1 = vand.u32 2147483647, %v2033_v24  ;;  %v2046_v48 = vor.u32 1.1754944e-38, %v2045_v60 }
 0x578   : > { %v2016_v35 = vsub.f32 1.0, %v2015_v33 }
 0x579   : > { %v1998_v37 = vmul.f32 %v2391_v25, %v1997_v34  ;;  %vm2044_vm15 = vcmp.eq.f32.partialorder %v2043_v1, 8.507059e+37 }
 0x57a   : > { %v2017_v41 = vmul.f32 %v2393_v28, %v2016_v35 }
 0x57b   : > { %v2395_v43 = vpop.eup %2394  ;;  %v1999_v44 = vadd.f32 %v2391_v25, %v1998_v37 }
 0x57c   : > { %v2018_v50 = vadd.f32 %v2393_v28, %v2017_v41  ;;  %v2035_v51 = vmul.f32 %v2395_v43, %v2033_v24  ;;  %v2397_v58 = vpop.eup %2396  ;;  %vm2040_vm12 = vweird.f32 %v2395_v43 }
 0x57d   : > { %v2003_v53 = vsel %vm2002_vm7, %v2391_v25, %v1999_v44  ;;  %vm2041_vm14 = vmor %vm2039_vm13, %vm2040_vm12 }
 0x57e   : > { %v2008_v59 = vsel %vm2005_vm9, %v2007_v47, %v2003_v53  ;;  %v2022_v62 = vsel %vm2021_vm8, %v2393_v28, %v2018_v50  ;;  %v2036_v63 = vsub.f32 1.0, %v2035_v51 }
 0x57f   : > { %v2027_v0 = vsel %vm2024_vm10, %v2026_v52, %v2022_v62  ;;  %v2050_v61 = vmul.f32 %v2397_v58, %v2008_v59 }
 0x580   : > { %v2049_v3 = vmul.f32 %v2027_v0, %v4169_v8  ;;  %v2037_v6 = vmul.f32 %v2395_v43, %v2036_v63 }
 0x582   : > { %v2051_v45 = vadd.f32 %v2050_v61, %v2049_v3  ;;  %v2038_v49 = vadd.f32 %v2395_v43, %v2037_v6 }
 0x584   : > { %2398 = vtanh.f32 %v2051_v45  ;;  %v2062_v46 = vsel %vm2061_vm11, %v2051_v45, %v4169_v8  ;;  %v2042_v19 = vsel %vm2041_vm14, %v2395_v43, %v2038_v49 }
 0x585   : > { %2068 = vst [vmem:[#allocation3] sm:$0xff] %v2062_v46  ;;  %v2047_v57 = vsel %vm2044_vm15, %v2046_v48, %v2042_v19 }
 0x58a   : > { %v2399_v11 = vpop.eup %2398 }
 0x58b   : > { %v2053_v26 = vmul.f32 %v2399_v11, %v2047_v57 }
 0x58d   : > { %v2063_v27 = vsel %vm2061_vm11, %v2053_v26, %v4173_v31  ;;  %v2064_v30 = vsel %vm2061_vm11, %v2053_v26, 0.0 }
 0x58e   : > { %2239 = vst [vmem:[%s2477_s25 + $0x38] sm:$0xff] %v2064_v30 }
 0x58f   : > { %2067 = vst [vmem:[#allocation2] sm:$0xff] %v2063_v27 }
 0x590 PF: > { %s13_s14 = sadd.s32 1, %s2423_s14   ;;  %s4334_s12 = smov %s2419_s13 }
 0x591   : > { %p10_p6 = scmp.ge.s32.totalorder %s13_s14, 4   ;;  %s4335_s13 = smov %s4337_s15 }
 0x593   :  { %12 = sbr.rel (!%p10_p6) target bundleno = 2 (0x2), region = 83 }

</bundles_post_ra>
